<compile_context>
chip_gen: v7x
topology: tpu7x:2x2x1
jax: 0.10.0
libtpu: 0.0.40
codegen_flags: <defaults>
</compile_context>

<pallas_src>
from collections import namedtuple

import numpy as np

import jax
import jax.numpy as jnp
from jax.experimental import pallas as pl
from jax.experimental.pallas import tpu as pltpu


# ------------------------------ static geometry -------------------------------

Dims = namedtuple("Dims", "H W oh2 ow2 oh4 ow4 W4 BS LEAD m4 m4pad M2P")


def _round_up(x, m):
    return (x + m - 1) // m * m


def _derive_dims(H, W):
    oh2 = (H - 3) // 2 + 1          # conv2: k=3, s=2, p=0
    ow2 = (W - 3) // 2 + 1
    oh4 = (oh2 - 1) // 2 + 1        # conv4: k=5, s=2, p=2
    ow4 = (ow2 - 1) // 2 + 1
    W4 = ow4                        # per-parity-block padded width == ow4
    BS = oh4 * W4                   # per-parity-block padded size == m4
    LEAD = 2 * W4                   # leading pad so shifted reads stay in-bounds
    m4 = oh4 * ow4
    m4pad = _round_up(m4, 128)      # lane-dense output store
    M2P = _round_up(LEAD + 4 * BS + 2 * W4, 128)
    return Dims(H, W, oh2, ow2, oh4, ow4, W4, BS, LEAD, m4, m4pad, M2P)


def _to_m2p_layout(a, d):
    """(..., oh2, ow2) -> (..., M2P) parity-block padded flat layout.

    Block b = 2*(row%2) + (col%2); inside a block positions are row-major with
    width padded to W4 (= ow4) and height padded to oh4, so conv4's stride-2
    taps become contiguous constant-offset slices in this flat layout.
    """
    lead_shape = a.shape[:-2]
    parts = [jnp.zeros(lead_shape + (d.LEAD,), a.dtype)]
    for pe in range(2):
        for qe in range(2):
            sub = a[..., pe::2, qe::2]
            pad_r = d.oh4 - sub.shape[-2]
            pad_c = d.W4 - sub.shape[-1]
            sub = jnp.pad(sub, [(0, 0)] * (a.ndim - 2) + [(0, pad_r), (0, pad_c)])
            parts.append(sub.reshape(lead_shape + (d.BS,)))
    parts.append(jnp.zeros(lead_shape + (d.M2P - d.LEAD - 4 * d.BS,), a.dtype))
    return jnp.concatenate(parts, axis=-1)


# ------------------------------ Pallas kernel ---------------------------------

def _make_kernel(d):
    # Static per-tap read offsets for conv4 into the parity-block layout:
    # tap (i, j) reads h3[:, off : off + m4] (one contiguous slice).
    off4 = []
    for i in range(5):
        for j in range(5):
            pe, qe = i % 2, j % 2
            blk = 2 * pe + qe
            dr = (i - 2 - pe) // 2
            dc = (j - 2 - qe) // 2
            off4.append(d.LEAD + blk * d.BS + dr * d.W4 + dc)

    def kernel(taps_ref, w1_ref, b1_ref, w2_ref, b2_ref, w3_ref, b3_ref,
               w4_ref, b4_ref, mask4_ref, o_ref, p2_ref, p4_ref):
        f32 = jnp.float32
        c1o = w1_ref.shape[0]        # 8  (conv1 out)
        c4 = w3_ref.shape[0]         # 8  (conv3 out)

        # ---- conv1 (1x1) + ReLU applied per conv2 tap; results packed into
        #      rows [8p, 8p+8) of the K=72 conv2 patch scratch. ----
        w1 = w1_ref[...]                                         # (8, 3)
        b1b = jnp.broadcast_to(b1_ref[...], (c1o, d.M2P))        # hoisted
        for p in range(9):
            xp = taps_ref[0, p]                                  # (3, M2P)
            h1p = jnp.maximum(
                jnp.dot(w1, xp, preferred_element_type=f32) + b1b, 0.0)
            p2_ref[c1o * p:c1o * (p + 1), :] = h1p

        # ---- conv2 (3x3, stride 2) as ONE K=72 matmul + bias + ReLU ----
        h2 = jnp.maximum(
            jnp.dot(w2_ref[...], p2_ref[...], preferred_element_type=f32)
            + b2_ref[...], 0.0)                                  # (16, M2P)

        # ---- conv3 (1x1) + ReLU ----
        h3 = jnp.maximum(
            jnp.dot(w3_ref[...], h2, preferred_element_type=f32)
            + b3_ref[...], 0.0)                                  # (8, M2P)

        # ---- conv4 (5x5, stride 2, pad 2): 25 contiguous shifted-window
        #      slices (no strided/gather work), zero-pad handled by a 0/1 mask,
        #      packed into a K=200 patch -> ONE matmul + bias + ReLU. ----
        if d.m4pad > d.m4:
            p4_ref[:, d.m4:] = jnp.zeros((25 * c4, d.m4pad - d.m4), f32)
        for p in range(25):
            win = h3[:, off4[p]:off4[p] + d.m4]                  # (8, m4)
            p4_ref[c4 * p:c4 * (p + 1), :d.m4] = win * mask4_ref[p:p + 1, :]
        out = jnp.maximum(
            jnp.dot(w4_ref[...], p4_ref[...], preferred_element_type=f32)
            + b4_ref[...], 0.0)                                  # (8, m4pad)
        o_ref[0] = out

    return kernel


# ------------------------- parameter / constant prep --------------------------

def init_params(key):
    """Deterministic params matching the PyTorch module's shapes (OIHW)."""
    def conv_param(k, cout, cin, ksz):
        kw_, kb_ = jax.random.split(k)
        fan_in = cin * ksz * ksz
        bound = 1.0 / np.sqrt(fan_in)
        w = jax.random.uniform(kw_, (cout, cin, ksz, ksz), jnp.float32,
                               -bound, bound)
        b = jax.random.uniform(kb_, (cout,), jnp.float32, -bound, bound)
        return w, b

    k1, k2, k3, k4 = jax.random.split(key, 4)
    return {
        "conv1": conv_param(k1, 8, 3, 1),    # Conv2d(3, 8, 1, stride=1, pad=0)
        "conv2": conv_param(k2, 16, 8, 3),   # Conv2d(8, 16, 3, stride=2, pad=0)
        "conv3": conv_param(k3, 8, 16, 1),   # Conv2d(16, 8, 1, stride=1, pad=0)
        "conv4": conv_param(k4, 8, 8, 5),    # Conv2d(8, 8, 5, stride=2, pad=2)
    }


def prepare_kernel_params(params, in_hw):
    """One-time (outside jit) repack into the layouts the kernel consumes."""
    H, W = in_hw
    d = _derive_dims(H, W)
    w1, b1 = params["conv1"]
    w2, b2 = params["conv2"]
    w3, b3 = params["conv3"]
    w4, b4 = params["conv4"]

    # conv4 zero-padding validity mask per tap / output position (tiny, static).
    r = np.arange(d.oh4)[:, None]
    c = np.arange(d.ow4)[None, :]
    mask4 = np.zeros((25, d.m4), np.float32)
    for i in range(5):
        for j in range(5):
            rr = 2 * r + i - 2
            cc = 2 * c + j - 2
            valid = (rr >= 0) & (rr < d.oh2) & (cc >= 0) & (cc < d.ow2)
            mask4[5 * i + j] = valid.astype(np.float32).reshape(-1)

    return {
        "w1": w1.reshape(8, 3),
        "b1": b1.reshape(8, 1),
        "w2f": jnp.transpose(w2, (0, 2, 3, 1)).reshape(16, 72),   # K=72 folding
        "b2": b2.reshape(16, 1),
        "w3": w3.reshape(8, 16),
        "b3": b3.reshape(8, 1),
        "w4f": jnp.transpose(w4, (0, 2, 3, 1)).reshape(8, 200),   # K=200 folding
        "b4": b4.reshape(8, 1),
        "mask4": jnp.asarray(mask4),
    }


# --------------------------------- the model ----------------------------------

@jax.jit
def model_forward(kp, x_nchw):
    B, C, H, W = x_nchw.shape
    d = _derive_dims(H, W)

    # 9 stride-2 taps of the raw input (conv2's receptive positions), written
    # directly in the parity-block-padded m2 layout (cheap XLA slices/pads).
    taps = []
    for i in range(3):
        for j in range(3):
            taps.append(x_nchw[:, :, i:i + 2 * (d.oh2 - 1) + 1:2,
                                     j:j + 2 * (d.ow2 - 1) + 1:2])
    taps = jnp.stack(taps, axis=1)               # (B, 9, 3, oh2, ow2)
    taps = _to_m2p_layout(taps, d)               # (B, 9, 3, M2P)

    out = pl.pallas_call(
        _make_kernel(d),
        out_shape=jax.ShapeDtypeStruct((B, 8, d.m4pad), jnp.float32),
        grid_spec=pltpu.PrefetchScalarGridSpec(
            num_scalar_prefetch=0,
            grid=(B,),
            in_specs=[
                pl.BlockSpec((1, 9, C, d.M2P), lambda b: (b, 0, 0, 0)),  # taps
                pl.BlockSpec((8, C), lambda b: (0, 0)),                  # w1
                pl.BlockSpec((8, 1), lambda b: (0, 0)),                  # b1
                pl.BlockSpec((16, 72), lambda b: (0, 0)),                # w2f
                pl.BlockSpec((16, 1), lambda b: (0, 0)),                 # b2
                pl.BlockSpec((8, 16), lambda b: (0, 0)),                 # w3
                pl.BlockSpec((8, 1), lambda b: (0, 0)),                  # b3
                pl.BlockSpec((8, 200), lambda b: (0, 0)),                # w4f
                pl.BlockSpec((8, 1), lambda b: (0, 0)),                  # b4
                pl.BlockSpec((25, d.m4), lambda b: (0, 0)),              # mask4
            ],
            out_specs=pl.BlockSpec((1, 8, d.m4pad), lambda b: (b, 0, 0)),
            scratch_shapes=[
                pltpu.VMEM((72, d.M2P), jnp.float32),     # conv2 K=72 patch
                pltpu.VMEM((200, d.m4pad), jnp.float32),  # conv4 K=200 patch
            ],
        ),
        compiler_params=pltpu.CompilerParams(
            dimension_semantics=("parallel",),
            vmem_limit_bytes=40 * 1024 * 1024,
        ),
    )(taps, kp["w1"], kp["b1"], kp["w2f"], kp["b2"], kp["w3"], kp["b3"],
      kp["w4f"], kp["b4"], kp["mask4"])

    return out[:, :, :d.m4].reshape(B, 8, d.oh4, d.ow4)   # NCHW


# --------------------------------- reference -----------------------------------

def _ref_conv_relu(x_nhwc, w_oihw, b, stride, padding):
    w_hwio = jnp.transpose(w_oihw, (2, 3, 1, 0))
    y = jax.lax.conv_general_dilated(
        x_nhwc, w_hwio, window_strides=(stride, stride),
        padding=[(padding, padding), (padding, padding)],
        dimension_numbers=("NHWC", "HWIO", "NHWC"))
    return jnp.maximum(y + b, 0.0)


def ref_forward(params, x_nchw):
    x = jnp.transpose(x_nchw, (0, 2, 3, 1))
    x = _ref_conv_relu(x, *params["conv1"], 1, 0)
    x = _ref_conv_relu(x, *params["conv2"], 2, 0)
    x = _ref_conv_relu(x, *params["conv3"], 1, 0)
    x = _ref_conv_relu(x, *params["conv4"], 2, 2)
    return jnp.transpose(x, (0, 3, 1, 2))


# ----------------------------------- main ---------------------------------------

if __name__ == "__main__":
    key = jax.random.PRNGKey(0)
    kp_key, kx_key = jax.random.split(key)

    params = init_params(kp_key)
    # Small-shape stand-in for torch.randn(1, 3, 256, 256); NCHW like PyTorch.
    x = jax.random.normal(kx_key, (2, 3, 32, 32), jnp.float32)

    kparams = prepare_kernel_params(params, in_hw=(x.shape[2], x.shape[3]))

    out = model_forward(kparams, x)
    out = jax.block_until_ready(out)

    ref = ref_forward(params, x)
    assert out.shape == (2, 8, 8, 8), out.shape
    assert jnp.allclose(out, ref, atol=1e-4, rtol=1e-4), "mismatch vs reference"

    print("KERNEL_OK")
</pallas_src>

<mosaic_0001>
module attributes {stable_mosaic.version = 11 : i64} {
  func.func @kernel(%arg0: i32, %arg1: memref<1x9x3x384xf32, #tpu.memory_space<vmem>>, %arg2: memref<8x3xf32, #tpu.memory_space<vmem>>, %arg3: memref<8x1xf32, #tpu.memory_space<vmem>>, %arg4: memref<16x72xf32, #tpu.memory_space<vmem>>, %arg5: memref<16x1xf32, #tpu.memory_space<vmem>>, %arg6: memref<8x16xf32, #tpu.memory_space<vmem>>, %arg7: memref<8x1xf32, #tpu.memory_space<vmem>>, %arg8: memref<8x200xf32, #tpu.memory_space<vmem>>, %arg9: memref<8x1xf32, #tpu.memory_space<vmem>>, %arg10: memref<25x64xf32, #tpu.memory_space<vmem>>, %arg11: memref<1x8x128xf32, #tpu.memory_space<vmem>>, %arg12: memref<72x384xf32, #tpu.memory_space<vmem>>, %arg13: memref<200x128xf32, #tpu.memory_space<vmem>>) attributes {dimension_semantics = [#tpu.dimension_semantics<parallel>], iteration_bounds = array<i64: 2>, scalar_prefetch = 0 : i64, scratch_operands = 2 : i64, tpu.core_type = #tpu.core_type<tc>, window_params = [{transform_indices = @transform_0, window_bounds = array<i64: 1, 9, 3, 384>}, {pipeline_mode = #tpu.pipeline_mode<synchronous>, transform_indices = @transform_1, window_bounds = array<i64: 8, 3>}, {pipeline_mode = #tpu.pipeline_mode<synchronous>, transform_indices = @transform_2, window_bounds = array<i64: 8, 1>}, {pipeline_mode = #tpu.pipeline_mode<synchronous>, transform_indices = @transform_3, window_bounds = array<i64: 16, 72>}, {pipeline_mode = #tpu.pipeline_mode<synchronous>, transform_indices = @transform_4, window_bounds = array<i64: 16, 1>}, {pipeline_mode = #tpu.pipeline_mode<synchronous>, transform_indices = @transform_5, window_bounds = array<i64: 8, 16>}, {pipeline_mode = #tpu.pipeline_mode<synchronous>, transform_indices = @transform_6, window_bounds = array<i64: 8, 1>}, {pipeline_mode = #tpu.pipeline_mode<synchronous>, transform_indices = @transform_7, window_bounds = array<i64: 8, 200>}, {pipeline_mode = #tpu.pipeline_mode<synchronous>, transform_indices = @transform_8, window_bounds = array<i64: 8, 1>}, {pipeline_mode = #tpu.pipeline_mode<synchronous>, transform_indices = @transform_9, window_bounds = array<i64: 25, 64>}, {transform_indices = @transform_10, window_bounds = array<i64: 1, 8, 128>}]} {
    %c0 = arith.constant 0 : index
    %c0_0 = arith.constant 0 : index
    %0 = vector.load %arg2[%c0, %c0_0] : memref<8x3xf32, #tpu.memory_space<vmem>>, vector<8x3xf32>
    %c0_1 = arith.constant 0 : index
    %c0_2 = arith.constant 0 : index
    %1 = vector.load %arg3[%c0_1, %c0_2] : memref<8x1xf32, #tpu.memory_space<vmem>>, vector<8x1xf32>
    %2 = vector.shape_cast %1 : vector<8x1xf32> to vector<8x1xf32>
    %3 = vector.broadcast %2 : vector<8x1xf32> to vector<8x384xf32>
    %c0_3 = arith.constant 0 : index
    %c0_4 = arith.constant 0 : index
    %c0_5 = arith.constant 0 : index
    %c0_6 = arith.constant 0 : index
    %4 = vector.load %arg1[%c0_3, %c0_4, %c0_5, %c0_6] : memref<1x9x3x384xf32, #tpu.memory_space<vmem>>, vector<1x1x3x384xf32>
    %5 = vector.shape_cast %4 : vector<1x1x3x384xf32> to vector<3x384xf32>
    %cst = arith.constant dense<0.000000e+00> : vector<8x384xf32>
    %6 = tpu.matmul %0, %5, %cst {dimension_numbers = #tpu.dot_dimension_numbers<[1], [0], [0], [1], [0, 0, 1, 1], [], []>} : vector<8x3xf32>, vector<3x384xf32>, vector<8x384xf32> -> vector<8x384xf32>
    %7 = arith.addf %6, %3 : vector<8x384xf32>
    %cst_7 = arith.constant 0.000000e+00 : f32
    %8 = vector.broadcast %cst_7 : f32 to vector<8x384xf32>
    %9 = arith.maximumf %7, %8 : vector<8x384xf32>
    %c0_8 = arith.constant 0 : index
    %c0_9 = arith.constant 0 : index
    %10 = vector.load %arg12[%c0_8, %c0_9] : memref<72x384xf32, #tpu.memory_space<vmem>>, vector<8x384xf32>
    tpu.vector_store %arg12[%c0_8, %c0_9], %9 {strides = array<i32>} : memref<72x384xf32, #tpu.memory_space<vmem>>, vector<8x384xf32>,
    %c0_10 = arith.constant 0 : index
    %c1 = arith.constant 1 : index
    %c0_11 = arith.constant 0 : index
    %c0_12 = arith.constant 0 : index
    %11 = vector.load %arg1[%c0_10, %c1, %c0_11, %c0_12] : memref<1x9x3x384xf32, #tpu.memory_space<vmem>>, vector<1x1x3x384xf32>
    %12 = vector.shape_cast %11 : vector<1x1x3x384xf32> to vector<3x384xf32>
    %cst_13 = arith.constant dense<0.000000e+00> : vector<8x384xf32>
    %13 = tpu.matmul %0, %12, %cst_13 {dimension_numbers = #tpu.dot_dimension_numbers<[1], [0], [0], [1], [0, 0, 1, 1], [], []>} : vector<8x3xf32>, vector<3x384xf32>, vector<8x384xf32> -> vector<8x384xf32>
    %14 = arith.addf %13, %3 : vector<8x384xf32>
    %cst_14 = arith.constant 0.000000e+00 : f32
    %15 = vector.broadcast %cst_14 : f32 to vector<8x384xf32>
    %16 = arith.maximumf %14, %15 : vector<8x384xf32>
    %c8 = arith.constant 8 : index
    %c0_15 = arith.constant 0 : index
    %17 = vector.load %arg12[%c8, %c0_15] : memref<72x384xf32, #tpu.memory_space<vmem>>, vector<8x384xf32>
    tpu.vector_store %arg12[%c8, %c0_15], %16 {strides = array<i32>} : memref<72x384xf32, #tpu.memory_space<vmem>>, vector<8x384xf32>,
    %c0_16 = arith.constant 0 : index
    %c2 = arith.constant 2 : index
    %c0_17 = arith.constant 0 : index
    %c0_18 = arith.constant 0 : index
    %18 = vector.load %arg1[%c0_16, %c2, %c0_17, %c0_18] : memref<1x9x3x384xf32, #tpu.memory_space<vmem>>, vector<1x1x3x384xf32>
    %19 = vector.shape_cast %18 : vector<1x1x3x384xf32> to vector<3x384xf32>
    %cst_19 = arith.constant dense<0.000000e+00> : vector<8x384xf32>
    %20 = tpu.matmul %0, %19, %cst_19 {dimension_numbers = #tpu.dot_dimension_numbers<[1], [0], [0], [1], [0, 0, 1, 1], [], []>} : vector<8x3xf32>, vector<3x384xf32>, vector<8x384xf32> -> vector<8x384xf32>
    %21 = arith.addf %20, %3 : vector<8x384xf32>
    %cst_20 = arith.constant 0.000000e+00 : f32
    %22 = vector.broadcast %cst_20 : f32 to vector<8x384xf32>
    %23 = arith.maximumf %21, %22 : vector<8x384xf32>
    %c16 = arith.constant 16 : index
    %c0_21 = arith.constant 0 : index
    %24 = vector.load %arg12[%c16, %c0_21] : memref<72x384xf32, #tpu.memory_space<vmem>>, vector<8x384xf32>
    tpu.vector_store %arg12[%c16, %c0_21], %23 {strides = array<i32>} : memref<72x384xf32, #tpu.memory_space<vmem>>, vector<8x384xf32>,
    %c0_22 = arith.constant 0 : index
    %c3 = arith.constant 3 : index
    %c0_23 = arith.constant 0 : index
    %c0_24 = arith.constant 0 : index
    %25 = vector.load %arg1[%c0_22, %c3, %c0_23, %c0_24] : memref<1x9x3x384xf32, #tpu.memory_space<vmem>>, vector<1x1x3x384xf32>
    %26 = vector.shape_cast %25 : vector<1x1x3x384xf32> to vector<3x384xf32>
    %cst_25 = arith.constant dense<0.000000e+00> : vector<8x384xf32>
    %27 = tpu.matmul %0, %26, %cst_25 {dimension_numbers = #tpu.dot_dimension_numbers<[1], [0], [0], [1], [0, 0, 1, 1], [], []>} : vector<8x3xf32>, vector<3x384xf32>, vector<8x384xf32> -> vector<8x384xf32>
    %28 = arith.addf %27, %3 : vector<8x384xf32>
    %cst_26 = arith.constant 0.000000e+00 : f32
    %29 = vector.broadcast %cst_26 : f32 to vector<8x384xf32>
    %30 = arith.maximumf %28, %29 : vector<8x384xf32>
    %c24 = arith.constant 24 : index
    %c0_27 = arith.constant 0 : index
    %31 = vector.load %arg12[%c24, %c0_27] : memref<72x384xf32, #tpu.memory_space<vmem>>, vector<8x384xf32>
    tpu.vector_store %arg12[%c24, %c0_27], %30 {strides = array<i32>} : memref<72x384xf32, #tpu.memory_space<vmem>>, vector<8x384xf32>,
    %c0_28 = arith.constant 0 : index
    %c4 = arith.constant 4 : index
    %c0_29 = arith.constant 0 : index
    %c0_30 = arith.constant 0 : index
    %32 = vector.load %arg1[%c0_28, %c4, %c0_29, %c0_30] : memref<1x9x3x384xf32, #tpu.memory_space<vmem>>, vector<1x1x3x384xf32>
    %33 = vector.shape_cast %32 : vector<1x1x3x384xf32> to vector<3x384xf32>
    %cst_31 = arith.constant dense<0.000000e+00> : vector<8x384xf32>
    %34 = tpu.matmul %0, %33, %cst_31 {dimension_numbers = #tpu.dot_dimension_numbers<[1], [0], [0], [1], [0, 0, 1, 1], [], []>} : vector<8x3xf32>, vector<3x384xf32>, vector<8x384xf32> -> vector<8x384xf32>
    %35 = arith.addf %34, %3 : vector<8x384xf32>
    %cst_32 = arith.constant 0.000000e+00 : f32
    %36 = vector.broadcast %cst_32 : f32 to vector<8x384xf32>
    %37 = arith.maximumf %35, %36 : vector<8x384xf32>
    %c32 = arith.constant 32 : index
    %c0_33 = arith.constant 0 : index
    %38 = vector.load %arg12[%c32, %c0_33] : memref<72x384xf32, #tpu.memory_space<vmem>>, vector<8x384xf32>
    tpu.vector_store %arg12[%c32, %c0_33], %37 {strides = array<i32>} : memref<72x384xf32, #tpu.memory_space<vmem>>, vector<8x384xf32>,
    %c0_34 = arith.constant 0 : index
    %c5 = arith.constant 5 : index
    %c0_35 = arith.constant 0 : index
    %c0_36 = arith.constant 0 : index
    %39 = vector.load %arg1[%c0_34, %c5, %c0_35, %c0_36] : memref<1x9x3x384xf32, #tpu.memory_space<vmem>>, vector<1x1x3x384xf32>
    %40 = vector.shape_cast %39 : vector<1x1x3x384xf32> to vector<3x384xf32>
    %cst_37 = arith.constant dense<0.000000e+00> : vector<8x384xf32>
    %41 = tpu.matmul %0, %40, %cst_37 {dimension_numbers = #tpu.dot_dimension_numbers<[1], [0], [0], [1], [0, 0, 1, 1], [], []>} : vector<8x3xf32>, vector<3x384xf32>, vector<8x384xf32> -> vector<8x384xf32>
    %42 = arith.addf %41, %3 : vector<8x384xf32>
    %cst_38 = arith.constant 0.000000e+00 : f32
    %43 = vector.broadcast %cst_38 : f32 to vector<8x384xf32>
    %44 = arith.maximumf %42, %43 : vector<8x384xf32>
    %c40 = arith.constant 40 : index
    %c0_39 = arith.constant 0 : index
    %45 = vector.load %arg12[%c40, %c0_39] : memref<72x384xf32, #tpu.memory_space<vmem>>, vector<8x384xf32>
    tpu.vector_store %arg12[%c40, %c0_39], %44 {strides = array<i32>} : memref<72x384xf32, #tpu.memory_space<vmem>>, vector<8x384xf32>,
    %c0_40 = arith.constant 0 : index
    %c6 = arith.constant 6 : index
    %c0_41 = arith.constant 0 : index
    %c0_42 = arith.constant 0 : index
    %46 = vector.load %arg1[%c0_40, %c6, %c0_41, %c0_42] : memref<1x9x3x384xf32, #tpu.memory_space<vmem>>, vector<1x1x3x384xf32>
    %47 = vector.shape_cast %46 : vector<1x1x3x384xf32> to vector<3x384xf32>
    %cst_43 = arith.constant dense<0.000000e+00> : vector<8x384xf32>
    %48 = tpu.matmul %0, %47, %cst_43 {dimension_numbers = #tpu.dot_dimension_numbers<[1], [0], [0], [1], [0, 0, 1, 1], [], []>} : vector<8x3xf32>, vector<3x384xf32>, vector<8x384xf32> -> vector<8x384xf32>
    %49 = arith.addf %48, %3 : vector<8x384xf32>
    %cst_44 = arith.constant 0.000000e+00 : f32
    %50 = vector.broadcast %cst_44 : f32 to vector<8x384xf32>
    %51 = arith.maximumf %49, %50 : vector<8x384xf32>
    %c48 = arith.constant 48 : index
    %c0_45 = arith.constant 0 : index
    %52 = vector.load %arg12[%c48, %c0_45] : memref<72x384xf32, #tpu.memory_space<vmem>>, vector<8x384xf32>
    tpu.vector_store %arg12[%c48, %c0_45], %51 {strides = array<i32>} : memref<72x384xf32, #tpu.memory_space<vmem>>, vector<8x384xf32>,
    %c0_46 = arith.constant 0 : index
    %c7 = arith.constant 7 : index
    %c0_47 = arith.constant 0 : index
    %c0_48 = arith.constant 0 : index
    %53 = vector.load %arg1[%c0_46, %c7, %c0_47, %c0_48] : memref<1x9x3x384xf32, #tpu.memory_space<vmem>>, vector<1x1x3x384xf32>
    %54 = vector.shape_cast %53 : vector<1x1x3x384xf32> to vector<3x384xf32>
    %cst_49 = arith.constant dense<0.000000e+00> : vector<8x384xf32>
    %55 = tpu.matmul %0, %54, %cst_49 {dimension_numbers = #tpu.dot_dimension_numbers<[1], [0], [0], [1], [0, 0, 1, 1], [], []>} : vector<8x3xf32>, vector<3x384xf32>, vector<8x384xf32> -> vector<8x384xf32>
    %56 = arith.addf %55, %3 : vector<8x384xf32>
    %cst_50 = arith.constant 0.000000e+00 : f32
    %57 = vector.broadcast %cst_50 : f32 to vector<8x384xf32>
    %58 = arith.maximumf %56, %57 : vector<8x384xf32>
    %c56 = arith.constant 56 : index
    %c0_51 = arith.constant 0 : index
    %59 = vector.load %arg12[%c56, %c0_51] : memref<72x384xf32, #tpu.memory_space<vmem>>, vector<8x384xf32>
    tpu.vector_store %arg12[%c56, %c0_51], %58 {strides = array<i32>} : memref<72x384xf32, #tpu.memory_space<vmem>>, vector<8x384xf32>,
    %c0_52 = arith.constant 0 : index
    %c8_53 = arith.constant 8 : index
    %c0_54 = arith.constant 0 : index
    %c0_55 = arith.constant 0 : index
    %60 = vector.load %arg1[%c0_52, %c8_53, %c0_54, %c0_55] : memref<1x9x3x384xf32, #tpu.memory_space<vmem>>, vector<1x1x3x384xf32>
    %61 = vector.shape_cast %60 : vector<1x1x3x384xf32> to vector<3x384xf32>
    %cst_56 = arith.constant dense<0.000000e+00> : vector<8x384xf32>
    %62 = tpu.matmul %0, %61, %cst_56 {dimension_numbers = #tpu.dot_dimension_numbers<[1], [0], [0], [1], [0, 0, 1, 1], [], []>} : vector<8x3xf32>, vector<3x384xf32>, vector<8x384xf32> -> vector<8x384xf32>
    %63 = arith.addf %62, %3 : vector<8x384xf32>
    %cst_57 = arith.constant 0.000000e+00 : f32
    %64 = vector.broadcast %cst_57 : f32 to vector<8x384xf32>
    %65 = arith.maximumf %63, %64 : vector<8x384xf32>
    %c64 = arith.constant 64 : index
    %c0_58 = arith.constant 0 : index
    %66 = vector.load %arg12[%c64, %c0_58] : memref<72x384xf32, #tpu.memory_space<vmem>>, vector<8x384xf32>
    tpu.vector_store %arg12[%c64, %c0_58], %65 {strides = array<i32>} : memref<72x384xf32, #tpu.memory_space<vmem>>, vector<8x384xf32>,
    %c0_59 = arith.constant 0 : index
    %c0_60 = arith.constant 0 : index
    %67 = vector.load %arg4[%c0_59, %c0_60] : memref<16x72xf32, #tpu.memory_space<vmem>>, vector<16x72xf32>
    %c0_61 = arith.constant 0 : index
    %c0_62 = arith.constant 0 : index
    %68 = vector.load %arg12[%c0_61, %c0_62] : memref<72x384xf32, #tpu.memory_space<vmem>>, vector<72x384xf32>
    %cst_63 = arith.constant dense<0.000000e+00> : vector<16x384xf32>
    %69 = tpu.matmul %67, %68, %cst_63 {dimension_numbers = #tpu.dot_dimension_numbers<[1], [0], [0], [1], [0, 0, 1, 1], [], []>} : vector<16x72xf32>, vector<72x384xf32>, vector<16x384xf32> -> vector<16x384xf32>
    %c0_64 = arith.constant 0 : index
    %c0_65 = arith.constant 0 : index
    %70 = vector.load %arg5[%c0_64, %c0_65] : memref<16x1xf32, #tpu.memory_space<vmem>>, vector<16x1xf32>
    %71 = vector.broadcast %70 : vector<16x1xf32> to vector<16x384xf32>
    %72 = arith.addf %69, %71 : vector<16x384xf32>
    %cst_66 = arith.constant 0.000000e+00 : f32
    %73 = vector.broadcast %cst_66 : f32 to vector<16x384xf32>
    %74 = arith.maximumf %72, %73 : vector<16x384xf32>
    %c0_67 = arith.constant 0 : index
    %c0_68 = arith.constant 0 : index
    %75 = vector.load %arg6[%c0_67, %c0_68] : memref<8x16xf32, #tpu.memory_space<vmem>>, vector<8x16xf32>
    %cst_69 = arith.constant dense<0.000000e+00> : vector<8x384xf32>
    %76 = tpu.matmul %75, %74, %cst_69 {dimension_numbers = #tpu.dot_dimension_numbers<[1], [0], [0], [1], [0, 0, 1, 1], [], []>} : vector<8x16xf32>, vector<16x384xf32>, vector<8x384xf32> -> vector<8x384xf32>
    %c0_70 = arith.constant 0 : index
    %c0_71 = arith.constant 0 : index
    %77 = vector.load %arg7[%c0_70, %c0_71] : memref<8x1xf32, #tpu.memory_space<vmem>>, vector<8x1xf32>
    %78 = vector.broadcast %77 : vector<8x1xf32> to vector<8x384xf32>
    %79 = arith.addf %76, %78 : vector<8x384xf32>
    %cst_72 = arith.constant 0.000000e+00 : f32
    %80 = vector.broadcast %cst_72 : f32 to vector<8x384xf32>
    %81 = arith.maximumf %79, %80 : vector<8x384xf32>
    %cst_73 = arith.constant 0.000000e+00 : f32
    %82 = vector.broadcast %cst_73 : f32 to vector<200x64xf32>
    %c0_74 = arith.constant 0 : index
    %c64_75 = arith.constant 64 : index
    %83 = vector.load %arg13[%c0_74, %c64_75] : memref<200x128xf32, #tpu.memory_space<vmem>>, vector<200x64xf32>
    tpu.vector_store %arg13[%c0_74, %c64_75], %82 {strides = array<i32>} : memref<200x128xf32, #tpu.memory_space<vmem>>, vector<200x64xf32>,
    %84 = vector.extract_strided_slice %81 {offsets = [0, 7], sizes = [8, 64], strides = [1, 1]} : vector<8x384xf32> to vector<8x64xf32>
    %c0_76 = arith.constant 0 : index
    %c0_77 = arith.constant 0 : index
    %85 = vector.load %arg10[%c0_76, %c0_77] : memref<25x64xf32, #tpu.memory_space<vmem>>, vector<1x64xf32>
    %86 = vector.broadcast %85 : vector<1x64xf32> to vector<8x64xf32>
    %87 = arith.mulf %84, %86 : vector<8x64xf32>
    %c0_78 = arith.constant 0 : index
    %c0_79 = arith.constant 0 : index
    %88 = vector.load %arg13[%c0_78, %c0_79] : memref<200x128xf32, #tpu.memory_space<vmem>>, vector<8x64xf32>
    tpu.vector_store %arg13[%c0_78, %c0_79], %87 {strides = array<i32>} : memref<200x128xf32, #tpu.memory_space<vmem>>, vector<8x64xf32>,
    %89 = vector.extract_strided_slice %81 {offsets = [0, 71], sizes = [8, 64], strides = [1, 1]} : vector<8x384xf32> to vector<8x64xf32>
    %c1_80 = arith.constant 1 : index
    %c0_81 = arith.constant 0 : index
    %90 = vector.load %arg10[%c1_80, %c0_81] : memref<25x64xf32, #tpu.memory_space<vmem>>, vector<1x64xf32>
    %91 = vector.broadcast %90 : vector<1x64xf32> to vector<8x64xf32>
    %92 = arith.mulf %89, %91 : vector<8x64xf32>
    %c8_82 = arith.constant 8 : index
    %c0_83 = arith.constant 0 : index
    %93 = vector.load %arg13[%c8_82, %c0_83] : memref<200x128xf32, #tpu.memory_space<vmem>>, vector<8x64xf32>
    tpu.vector_store %arg13[%c8_82, %c0_83], %92 {strides = array<i32>} : memref<200x128xf32, #tpu.memory_space<vmem>>, vector<8x64xf32>,
    %94 = vector.extract_strided_slice %81 {offsets = [0, 8], sizes = [8, 64], strides = [1, 1]} : vector<8x384xf32> to vector<8x64xf32>
    %c2_84 = arith.constant 2 : index
    %c0_85 = arith.constant 0 : index
    %95 = vector.load %arg10[%c2_84, %c0_85] : memref<25x64xf32, #tpu.memory_space<vmem>>, vector<1x64xf32>
    %96 = vector.broadcast %95 : vector<1x64xf32> to vector<8x64xf32>
    %97 = arith.mulf %94, %96 : vector<8x64xf32>
    %c16_86 = arith.constant 16 : index
    %c0_87 = arith.constant 0 : index
    %98 = vector.load %arg13[%c16_86, %c0_87] : memref<200x128xf32, #tpu.memory_space<vmem>>, vector<8x64xf32>
    tpu.vector_store %arg13[%c16_86, %c0_87], %97 {strides = array<i32>} : memref<200x128xf32, #tpu.memory_space<vmem>>, vector<8x64xf32>,
    %99 = vector.extract_strided_slice %81 {offsets = [0, 72], sizes = [8, 64], strides = [1, 1]} : vector<8x384xf32> to vector<8x64xf32>
    %c3_88 = arith.constant 3 : index
    %c0_89 = arith.constant 0 : index
    %100 = vector.load %arg10[%c3_88, %c0_89] : memref<25x64xf32, #tpu.memory_space<vmem>>, vector<1x64xf32>
    %101 = vector.broadcast %100 : vector<1x64xf32> to vector<8x64xf32>
    %102 = arith.mulf %99, %101 : vector<8x64xf32>
    %c24_90 = arith.constant 24 : index
    %c0_91 = arith.constant 0 : index
    %103 = vector.load %arg13[%c24_90, %c0_91] : memref<200x128xf32, #tpu.memory_space<vmem>>, vector<8x64xf32>
    tpu.vector_store %arg13[%c24_90, %c0_91], %102 {strides = array<i32>} : memref<200x128xf32, #tpu.memory_space<vmem>>, vector<8x64xf32>,
    %104 = vector.extract_strided_slice %81 {offsets = [0, 9], sizes = [8, 64], strides = [1, 1]} : vector<8x384xf32> to vector<8x64xf32>
    %c4_92 = arith.constant 4 : index
    %c0_93 = arith.constant 0 : index
    %105 = vector.load %arg10[%c4_92, %c0_93] : memref<25x64xf32, #tpu.memory_space<vmem>>, vector<1x64xf32>
    %106 = vector.broadcast %105 : vector<1x64xf32> to vector<8x64xf32>
    %107 = arith.mulf %104, %106 : vector<8x64xf32>
    %c32_94 = arith.constant 32 : index
    %c0_95 = arith.constant 0 : index
    %108 = vector.load %arg13[%c32_94, %c0_95] : memref<200x128xf32, #tpu.memory_space<vmem>>, vector<8x64xf32>
    tpu.vector_store %arg13[%c32_94, %c0_95], %107 {strides = array<i32>} : memref<200x128xf32, #tpu.memory_space<vmem>>, vector<8x64xf32>,
    %109 = vector.extract_strided_slice %81 {offsets = [0, 135], sizes = [8, 64], strides = [1, 1]} : vector<8x384xf32> to vector<8x64xf32>
    %c5_96 = arith.constant 5 : index
    %c0_97 = arith.constant 0 : index
    %110 = vector.load %arg10[%c5_96, %c0_97] : memref<25x64xf32, #tpu.memory_space<vmem>>, vector<1x64xf32>
    %111 = vector.broadcast %110 : vector<1x64xf32> to vector<8x64xf32>
    %112 = arith.mulf %109, %111 : vector<8x64xf32>
    %c40_98 = arith.constant 40 : index
    %c0_99 = arith.constant 0 : index
    %113 = vector.load %arg13[%c40_98, %c0_99] : memref<200x128xf32, #tpu.memory_space<vmem>>, vector<8x64xf32>
    tpu.vector_store %arg13[%c40_98, %c0_99], %112 {strides = array<i32>} : memref<200x128xf32, #tpu.memory_space<vmem>>, vector<8x64xf32>,
    %114 = vector.extract_strided_slice %81 {offsets = [0, 199], sizes = [8, 64], strides = [1, 1]} : vector<8x384xf32> to vector<8x64xf32>
    %c6_100 = arith.constant 6 : index
    %c0_101 = arith.constant 0 : index
    %115 = vector.load %arg10[%c6_100, %c0_101] : memref<25x64xf32, #tpu.memory_space<vmem>>, vector<1x64xf32>
    %116 = vector.broadcast %115 : vector<1x64xf32> to vector<8x64xf32>
    %117 = arith.mulf %114, %116 : vector<8x64xf32>
    %c48_102 = arith.constant 48 : index
    %c0_103 = arith.constant 0 : index
    %118 = vector.load %arg13[%c48_102, %c0_103] : memref<200x128xf32, #tpu.memory_space<vmem>>, vector<8x64xf32>
    tpu.vector_store %arg13[%c48_102, %c0_103], %117 {strides = array<i32>} : memref<200x128xf32, #tpu.memory_space<vmem>>, vector<8x64xf32>,
    %119 = vector.extract_strided_slice %81 {offsets = [0, 136], sizes = [8, 64], strides = [1, 1]} : vector<8x384xf32> to vector<8x64xf32>
    %c7_104 = arith.constant 7 : index
    %c0_105 = arith.constant 0 : index
    %120 = vector.load %arg10[%c7_104, %c0_105] : memref<25x64xf32, #tpu.memory_space<vmem>>, vector<1x64xf32>
    %121 = vector.broadcast %120 : vector<1x64xf32> to vector<8x64xf32>
    %122 = arith.mulf %119, %121 : vector<8x64xf32>
    %c56_106 = arith.constant 56 : index
    %c0_107 = arith.constant 0 : index
    %123 = vector.load %arg13[%c56_106, %c0_107] : memref<200x128xf32, #tpu.memory_space<vmem>>, vector<8x64xf32>
    tpu.vector_store %arg13[%c56_106, %c0_107], %122 {strides = array<i32>} : memref<200x128xf32, #tpu.memory_space<vmem>>, vector<8x64xf32>,
    %124 = vector.extract_strided_slice %81 {offsets = [0, 200], sizes = [8, 64], strides = [1, 1]} : vector<8x384xf32> to vector<8x64xf32>
    %c8_108 = arith.constant 8 : index
    %c0_109 = arith.constant 0 : index
    %125 = vector.load %arg10[%c8_108, %c0_109] : memref<25x64xf32, #tpu.memory_space<vmem>>, vector<1x64xf32>
    %126 = vector.broadcast %125 : vector<1x64xf32> to vector<8x64xf32>
    %127 = arith.mulf %124, %126 : vector<8x64xf32>
    %c64_110 = arith.constant 64 : index
    %c0_111 = arith.constant 0 : index
    %128 = vector.load %arg13[%c64_110, %c0_111] : memref<200x128xf32, #tpu.memory_space<vmem>>, vector<8x64xf32>
    tpu.vector_store %arg13[%c64_110, %c0_111], %127 {strides = array<i32>} : memref<200x128xf32, #tpu.memory_space<vmem>>, vector<8x64xf32>,
    %129 = vector.extract_strided_slice %81 {offsets = [0, 137], sizes = [8, 64], strides = [1, 1]} : vector<8x384xf32> to vector<8x64xf32>
    %c9 = arith.constant 9 : index
    %c0_112 = arith.constant 0 : index
    %130 = vector.load %arg10[%c9, %c0_112] : memref<25x64xf32, #tpu.memory_space<vmem>>, vector<1x64xf32>
    %131 = vector.broadcast %130 : vector<1x64xf32> to vector<8x64xf32>
    %132 = arith.mulf %129, %131 : vector<8x64xf32>
    %c72 = arith.constant 72 : index
    %c0_113 = arith.constant 0 : index
    %133 = vector.load %arg13[%c72, %c0_113] : memref<200x128xf32, #tpu.memory_space<vmem>>, vector<8x64xf32>
    tpu.vector_store %arg13[%c72, %c0_113], %132 {strides = array<i32>} : memref<200x128xf32, #tpu.memory_space<vmem>>, vector<8x64xf32>,
    %134 = vector.extract_strided_slice %81 {offsets = [0, 15], sizes = [8, 64], strides = [1, 1]} : vector<8x384xf32> to vector<8x64xf32>
    %c10 = arith.constant 10 : index
    %c0_114 = arith.constant 0 : index
    %135 = vector.load %arg10[%c10, %c0_114] : memref<25x64xf32, #tpu.memory_space<vmem>>, vector<1x64xf32>
    %136 = vector.broadcast %135 : vector<1x64xf32> to vector<8x64xf32>
    %137 = arith.mulf %134, %136 : vector<8x64xf32>
    %c80 = arith.constant 80 : index
    %c0_115 = arith.constant 0 : index
    %138 = vector.load %arg13[%c80, %c0_115] : memref<200x128xf32, #tpu.memory_space<vmem>>, vector<8x64xf32>
    tpu.vector_store %arg13[%c80, %c0_115], %137 {strides = array<i32>} : memref<200x128xf32, #tpu.memory_space<vmem>>, vector<8x64xf32>,
    %139 = vector.extract_strided_slice %81 {offsets = [0, 79], sizes = [8, 64], strides = [1, 1]} : vector<8x384xf32> to vector<8x64xf32>
    %c11 = arith.constant 11 : index
    %c0_116 = arith.constant 0 : index
    %140 = vector.load %arg10[%c11, %c0_116] : memref<25x64xf32, #tpu.memory_space<vmem>>, vector<1x64xf32>
    %141 = vector.broadcast %140 : vector<1x64xf32> to vector<8x64xf32>
    %142 = arith.mulf %139, %141 : vector<8x64xf32>
    %c88 = arith.constant 88 : index
    %c0_117 = arith.constant 0 : index
    %143 = vector.load %arg13[%c88, %c0_117] : memref<200x128xf32, #tpu.memory_space<vmem>>, vector<8x64xf32>
    tpu.vector_store %arg13[%c88, %c0_117], %142 {strides = array<i32>} : memref<200x128xf32, #tpu.memory_space<vmem>>, vector<8x64xf32>,
    %144 = vector.extract_strided_slice %81 {offsets = [0, 16], sizes = [8, 64], strides = [1, 1]} : vector<8x384xf32> to vector<8x64xf32>
    %c12 = arith.constant 12 : index
    %c0_118 = arith.constant 0 : index
    %145 = vector.load %arg10[%c12, %c0_118] : memref<25x64xf32, #tpu.memory_space<vmem>>, vector<1x64xf32>
    %146 = vector.broadcast %145 : vector<1x64xf32> to vector<8x64xf32>
    %147 = arith.mulf %144, %146 : vector<8x64xf32>
    %c96 = arith.constant 96 : index
    %c0_119 = arith.constant 0 : index
    %148 = vector.load %arg13[%c96, %c0_119] : memref<200x128xf32, #tpu.memory_space<vmem>>, vector<8x64xf32>
    tpu.vector_store %arg13[%c96, %c0_119], %147 {strides = array<i32>} : memref<200x128xf32, #tpu.memory_space<vmem>>, vector<8x64xf32>,
    %149 = vector.extract_strided_slice %81 {offsets = [0, 80], sizes = [8, 64], strides = [1, 1]} : vector<8x384xf32> to vector<8x64xf32>
    %c13 = arith.constant 13 : index
    %c0_120 = arith.constant 0 : index
    %150 = vector.load %arg10[%c13, %c0_120] : memref<25x64xf32, #tpu.memory_space<vmem>>, vector<1x64xf32>
    %151 = vector.broadcast %150 : vector<1x64xf32> to vector<8x64xf32>
    %152 = arith.mulf %149, %151 : vector<8x64xf32>
    %c104 = arith.constant 104 : index
    %c0_121 = arith.constant 0 : index
    %153 = vector.load %arg13[%c104, %c0_121] : memref<200x128xf32, #tpu.memory_space<vmem>>, vector<8x64xf32>
    tpu.vector_store %arg13[%c104, %c0_121], %152 {strides = array<i32>} : memref<200x128xf32, #tpu.memory_space<vmem>>, vector<8x64xf32>,
    %154 = vector.extract_strided_slice %81 {offsets = [0, 17], sizes = [8, 64], strides = [1, 1]} : vector<8x384xf32> to vector<8x64xf32>
    %c14 = arith.constant 14 : index
    %c0_122 = arith.constant 0 : index
    %155 = vector.load %arg10[%c14, %c0_122] : memref<25x64xf32, #tpu.memory_space<vmem>>, vector<1x64xf32>
    %156 = vector.broadcast %155 : vector<1x64xf32> to vector<8x64xf32>
    %157 = arith.mulf %154, %156 : vector<8x64xf32>
    %c112 = arith.constant 112 : index
    %c0_123 = arith.constant 0 : index
    %158 = vector.load %arg13[%c112, %c0_123] : memref<200x128xf32, #tpu.memory_space<vmem>>, vector<8x64xf32>
    tpu.vector_store %arg13[%c112, %c0_123], %157 {strides = array<i32>} : memref<200x128xf32, #tpu.memory_space<vmem>>, vector<8x64xf32>,
    %159 = vector.extract_strided_slice %81 {offsets = [0, 143], sizes = [8, 64], strides = [1, 1]} : vector<8x384xf32> to vector<8x64xf32>
    %c15 = arith.constant 15 : index
    %c0_124 = arith.constant 0 : index
    %160 = vector.load %arg10[%c15, %c0_124] : memref<25x64xf32, #tpu.memory_space<vmem>>, vector<1x64xf32>
    %161 = vector.broadcast %160 : vector<1x64xf32> to vector<8x64xf32>
    %162 = arith.mulf %159, %161 : vector<8x64xf32>
    %c120 = arith.constant 120 : index
    %c0_125 = arith.constant 0 : index
    %163 = vector.load %arg13[%c120, %c0_125] : memref<200x128xf32, #tpu.memory_space<vmem>>, vector<8x64xf32>
    tpu.vector_store %arg13[%c120, %c0_125], %162 {strides = array<i32>} : memref<200x128xf32, #tpu.memory_space<vmem>>, vector<8x64xf32>,
    %164 = vector.extract_strided_slice %81 {offsets = [0, 207], sizes = [8, 64], strides = [1, 1]} : vector<8x384xf32> to vector<8x64xf32>
    %c16_126 = arith.constant 16 : index
    %c0_127 = arith.constant 0 : index
    %165 = vector.load %arg10[%c16_126, %c0_127] : memref<25x64xf32, #tpu.memory_space<vmem>>, vector<1x64xf32>
    %166 = vector.broadcast %165 : vector<1x64xf32> to vector<8x64xf32>
    %167 = arith.mulf %164, %166 : vector<8x64xf32>
    %c128 = arith.constant 128 : index
    %c0_128 = arith.constant 0 : index
    %168 = vector.load %arg13[%c128, %c0_128] : memref<200x128xf32, #tpu.memory_space<vmem>>, vector<8x64xf32>
    tpu.vector_store %arg13[%c128, %c0_128], %167 {strides = array<i32>} : memref<200x128xf32, #tpu.memory_space<vmem>>, vector<8x64xf32>,
    %169 = vector.extract_strided_slice %81 {offsets = [0, 144], sizes = [8, 64], strides = [1, 1]} : vector<8x384xf32> to vector<8x64xf32>
    %c17 = arith.constant 17 : index
    %c0_129 = arith.constant 0 : index
    %170 = vector.load %arg10[%c17, %c0_129] : memref<25x64xf32, #tpu.memory_space<vmem>>, vector<1x64xf32>
    %171 = vector.broadcast %170 : vector<1x64xf32> to vector<8x64xf32>
    %172 = arith.mulf %169, %171 : vector<8x64xf32>
    %c136 = arith.constant 136 : index
    %c0_130 = arith.constant 0 : index
    %173 = vector.load %arg13[%c136, %c0_130] : memref<200x128xf32, #tpu.memory_space<vmem>>, vector<8x64xf32>
    tpu.vector_store %arg13[%c136, %c0_130], %172 {strides = array<i32>} : memref<200x128xf32, #tpu.memory_space<vmem>>, vector<8x64xf32>,
    %174 = vector.extract_strided_slice %81 {offsets = [0, 208], sizes = [8, 64], strides = [1, 1]} : vector<8x384xf32> to vector<8x64xf32>
    %c18 = arith.constant 18 : index
    %c0_131 = arith.constant 0 : index
    %175 = vector.load %arg10[%c18, %c0_131] : memref<25x64xf32, #tpu.memory_space<vmem>>, vector<1x64xf32>
    %176 = vector.broadcast %175 : vector<1x64xf32> to vector<8x64xf32>
    %177 = arith.mulf %174, %176 : vector<8x64xf32>
    %c144 = arith.constant 144 : index
    %c0_132 = arith.constant 0 : index
    %178 = vector.load %arg13[%c144, %c0_132] : memref<200x128xf32, #tpu.memory_space<vmem>>, vector<8x64xf32>
    tpu.vector_store %arg13[%c144, %c0_132], %177 {strides = array<i32>} : memref<200x128xf32, #tpu.memory_space<vmem>>, vector<8x64xf32>,
    %179 = vector.extract_strided_slice %81 {offsets = [0, 145], sizes = [8, 64], strides = [1, 1]} : vector<8x384xf32> to vector<8x64xf32>
    %c19 = arith.constant 19 : index
    %c0_133 = arith.constant 0 : index
    %180 = vector.load %arg10[%c19, %c0_133] : memref<25x64xf32, #tpu.memory_space<vmem>>, vector<1x64xf32>
    %181 = vector.broadcast %180 : vector<1x64xf32> to vector<8x64xf32>
    %182 = arith.mulf %179, %181 : vector<8x64xf32>
    %c152 = arith.constant 152 : index
    %c0_134 = arith.constant 0 : index
    %183 = vector.load %arg13[%c152, %c0_134] : memref<200x128xf32, #tpu.memory_space<vmem>>, vector<8x64xf32>
    tpu.vector_store %arg13[%c152, %c0_134], %182 {strides = array<i32>} : memref<200x128xf32, #tpu.memory_space<vmem>>, vector<8x64xf32>,
    %184 = vector.extract_strided_slice %81 {offsets = [0, 23], sizes = [8, 64], strides = [1, 1]} : vector<8x384xf32> to vector<8x64xf32>
    %c20 = arith.constant 20 : index
    %c0_135 = arith.constant 0 : index
    %185 = vector.load %arg10[%c20, %c0_135] : memref<25x64xf32, #tpu.memory_space<vmem>>, vector<1x64xf32>
    %186 = vector.broadcast %185 : vector<1x64xf32> to vector<8x64xf32>
    %187 = arith.mulf %184, %186 : vector<8x64xf32>
    %c160 = arith.constant 160 : index
    %c0_136 = arith.constant 0 : index
    %188 = vector.load %arg13[%c160, %c0_136] : memref<200x128xf32, #tpu.memory_space<vmem>>, vector<8x64xf32>
    tpu.vector_store %arg13[%c160, %c0_136], %187 {strides = array<i32>} : memref<200x128xf32, #tpu.memory_space<vmem>>, vector<8x64xf32>,
    %189 = vector.extract_strided_slice %81 {offsets = [0, 87], sizes = [8, 64], strides = [1, 1]} : vector<8x384xf32> to vector<8x64xf32>
    %c21 = arith.constant 21 : index
    %c0_137 = arith.constant 0 : index
    %190 = vector.load %arg10[%c21, %c0_137] : memref<25x64xf32, #tpu.memory_space<vmem>>, vector<1x64xf32>
    %191 = vector.broadcast %190 : vector<1x64xf32> to vector<8x64xf32>
    %192 = arith.mulf %189, %191 : vector<8x64xf32>
    %c168 = arith.constant 168 : index
    %c0_138 = arith.constant 0 : index
    %193 = vector.load %arg13[%c168, %c0_138] : memref<200x128xf32, #tpu.memory_space<vmem>>, vector<8x64xf32>
    tpu.vector_store %arg13[%c168, %c0_138], %192 {strides = array<i32>} : memref<200x128xf32, #tpu.memory_space<vmem>>, vector<8x64xf32>,
    %194 = vector.extract_strided_slice %81 {offsets = [0, 24], sizes = [8, 64], strides = [1, 1]} : vector<8x384xf32> to vector<8x64xf32>
    %c22 = arith.constant 22 : index
    %c0_139 = arith.constant 0 : index
    %195 = vector.load %arg10[%c22, %c0_139] : memref<25x64xf32, #tpu.memory_space<vmem>>, vector<1x64xf32>
    %196 = vector.broadcast %195 : vector<1x64xf32> to vector<8x64xf32>
    %197 = arith.mulf %194, %196 : vector<8x64xf32>
    %c176 = arith.constant 176 : index
    %c0_140 = arith.constant 0 : index
    %198 = vector.load %arg13[%c176, %c0_140] : memref<200x128xf32, #tpu.memory_space<vmem>>, vector<8x64xf32>
    tpu.vector_store %arg13[%c176, %c0_140], %197 {strides = array<i32>} : memref<200x128xf32, #tpu.memory_space<vmem>>, vector<8x64xf32>,
    %199 = vector.extract_strided_slice %81 {offsets = [0, 88], sizes = [8, 64], strides = [1, 1]} : vector<8x384xf32> to vector<8x64xf32>
    %c23 = arith.constant 23 : index
    %c0_141 = arith.constant 0 : index
    %200 = vector.load %arg10[%c23, %c0_141] : memref<25x64xf32, #tpu.memory_space<vmem>>, vector<1x64xf32>
    %201 = vector.broadcast %200 : vector<1x64xf32> to vector<8x64xf32>
    %202 = arith.mulf %199, %201 : vector<8x64xf32>
    %c184 = arith.constant 184 : index
    %c0_142 = arith.constant 0 : index
    %203 = vector.load %arg13[%c184, %c0_142] : memref<200x128xf32, #tpu.memory_space<vmem>>, vector<8x64xf32>
    tpu.vector_store %arg13[%c184, %c0_142], %202 {strides = array<i32>} : memref<200x128xf32, #tpu.memory_space<vmem>>, vector<8x64xf32>,
    %204 = vector.extract_strided_slice %81 {offsets = [0, 25], sizes = [8, 64], strides = [1, 1]} : vector<8x384xf32> to vector<8x64xf32>
    %c24_143 = arith.constant 24 : index
    %c0_144 = arith.constant 0 : index
    %205 = vector.load %arg10[%c24_143, %c0_144] : memref<25x64xf32, #tpu.memory_space<vmem>>, vector<1x64xf32>
    %206 = vector.broadcast %205 : vector<1x64xf32> to vector<8x64xf32>
    %207 = arith.mulf %204, %206 : vector<8x64xf32>
    %c192 = arith.constant 192 : index
    %c0_145 = arith.constant 0 : index
    %208 = vector.load %arg13[%c192, %c0_145] : memref<200x128xf32, #tpu.memory_space<vmem>>, vector<8x64xf32>
    tpu.vector_store %arg13[%c192, %c0_145], %207 {strides = array<i32>} : memref<200x128xf32, #tpu.memory_space<vmem>>, vector<8x64xf32>,
    %c0_146 = arith.constant 0 : index
    %c0_147 = arith.constant 0 : index
    %209 = vector.load %arg8[%c0_146, %c0_147] : memref<8x200xf32, #tpu.memory_space<vmem>>, vector<8x200xf32>
    %c0_148 = arith.constant 0 : index
    %c0_149 = arith.constant 0 : index
    %210 = vector.load %arg13[%c0_148, %c0_149] : memref<200x128xf32, #tpu.memory_space<vmem>>, vector<200x128xf32>
    %cst_150 = arith.constant dense<0.000000e+00> : vector<8x128xf32>
    %211 = tpu.matmul %209, %210, %cst_150 {dimension_numbers = #tpu.dot_dimension_numbers<[1], [0], [0], [1], [0, 0, 1, 1], [], []>} : vector<8x200xf32>, vector<200x128xf32>, vector<8x128xf32> -> vector<8x128xf32>
    %c0_151 = arith.constant 0 : index
    %c0_152 = arith.constant 0 : index
    %212 = vector.load %arg9[%c0_151, %c0_152] : memref<8x1xf32, #tpu.memory_space<vmem>>, vector<8x1xf32>
    %213 = vector.broadcast %212 : vector<8x1xf32> to vector<8x128xf32>
    %214 = arith.addf %211, %213 : vector<8x128xf32>
    %cst_153 = arith.constant 0.000000e+00 : f32
    %215 = vector.broadcast %cst_153 : f32 to vector<8x128xf32>
    %216 = arith.maximumf %214, %215 : vector<8x128xf32>
    %c0_154 = arith.constant 0 : index
    %c0_155 = arith.constant 0 : index
    %c0_156 = arith.constant 0 : index
    %217 = vector.load %arg11[%c0_154, %c0_155, %c0_156] : memref<1x8x128xf32, #tpu.memory_space<vmem>>, vector<1x8x128xf32>
    %218 = vector.shape_cast %217 : vector<1x8x128xf32> to vector<8x128xf32>
    %219 = vector.shape_cast %216 : vector<8x128xf32> to vector<1x8x128xf32>
    tpu.vector_store %arg11[%c0_154, %c0_155, %c0_156], %219 {strides = array<i32>} : memref<1x8x128xf32, #tpu.memory_space<vmem>>, vector<1x8x128xf32>,
    return
  }
  func.func @transform_0(%arg0: i32) -> (i32, i32, i32, i32) {
    %c0_i32 = arith.constant 0 : i32
    %c0_i32_0 = arith.constant 0 : i32
    %c0_i32_1 = arith.constant 0 : i32
    %c0_i32_2 = arith.constant 0 : i32
    return %arg0, %c0_i32, %c0_i32_0, %c0_i32_1 : i32, i32, i32, i32
  }
  func.func @transform_1(%arg0: i32) -> (i32, i32) {
    %c0_i32 = arith.constant 0 : i32
    %c0_i32_0 = arith.constant 0 : i32
    %c0_i32_1 = arith.constant 0 : i32
    return %c0_i32, %c0_i32_0 : i32, i32
  }
  func.func @transform_2(%arg0: i32) -> (i32, i32) {
    %c0_i32 = arith.constant 0 : i32
    %c0_i32_0 = arith.constant 0 : i32
    %c0_i32_1 = arith.constant 0 : i32
    return %c0_i32, %c0_i32_0 : i32, i32
  }
  func.func @transform_3(%arg0: i32) -> (i32, i32) {
    %c0_i32 = arith.constant 0 : i32
    %c0_i32_0 = arith.constant 0 : i32
    %c0_i32_1 = arith.constant 0 : i32
    return %c0_i32, %c0_i32_0 : i32, i32
  }
  func.func @transform_4(%arg0: i32) -> (i32, i32) {
    %c0_i32 = arith.constant 0 : i32
    %c0_i32_0 = arith.constant 0 : i32
    %c0_i32_1 = arith.constant 0 : i32
    return %c0_i32, %c0_i32_0 : i32, i32
  }
  func.func @transform_5(%arg0: i32) -> (i32, i32) {
    %c0_i32 = arith.constant 0 : i32
    %c0_i32_0 = arith.constant 0 : i32
    %c0_i32_1 = arith.constant 0 : i32
    return %c0_i32, %c0_i32_0 : i32, i32
  }
  func.func @transform_6(%arg0: i32) -> (i32, i32) {
    %c0_i32 = arith.constant 0 : i32
    %c0_i32_0 = arith.constant 0 : i32
    %c0_i32_1 = arith.constant 0 : i32
    return %c0_i32, %c0_i32_0 : i32, i32
  }
  func.func @transform_7(%arg0: i32) -> (i32, i32) {
    %c0_i32 = arith.constant 0 : i32
    %c0_i32_0 = arith.constant 0 : i32
    %c0_i32_1 = arith.constant 0 : i32
    return %c0_i32, %c0_i32_0 : i32, i32
  }
  func.func @transform_8(%arg0: i32) -> (i32, i32) {
    %c0_i32 = arith.constant 0 : i32
    %c0_i32_0 = arith.constant 0 : i32
    %c0_i32_1 = arith.constant 0 : i32
    return %c0_i32, %c0_i32_0 : i32, i32
  }
  func.func @transform_9(%arg0: i32) -> (i32, i32) {
    %c0_i32 = arith.constant 0 : i32
    %c0_i32_0 = arith.constant 0 : i32
    %c0_i32_1 = arith.constant 0 : i32
    return %c0_i32, %c0_i32_0 : i32, i32
  }
  func.func @transform_10(%arg0: i32) -> (i32, i32, i32) {
    %c0_i32 = arith.constant 0 : i32
    %c0_i32_0 = arith.constant 0 : i32
    %c0_i32_1 = arith.constant 0 : i32
    return %arg0, %c0_i32, %c0_i32_0 : i32, i32, i32
  }
}

</mosaic_0001>

<bundles_post_ra>
// kernel: model_forward.1
= control target key start
LH: loop header
LB: loop body
LE: loop exit
PB: predicated region body
PF: predicated region fallthrough
CT: control target
= control target key end

     0   :  { %s3213_s13 = smov 0   ;;  %s3682_s0 = inlined_call_operand.vmem [shape: f32[2,9,3,384], index: 0, kind: input, shape index: {}]   ;;  %s3683_s1 = inlined_call_operand.vmem [shape: f32[8,3], index: 1, kind: input, shape index: {}]   ;;  %s3684_s2 = inlined_call_operand.vmem [shape: f32[8,1], index: 2, kind: input, shape index: {}]   ;;  %s3685_s3 = inlined_call_operand.vmem [shape: f32[16,72], index: 3, kind: input, shape index: {}]   ;;  %s3686_s4 = inlined_call_operand.vmem [shape: f32[16,1], index: 4, kind: input, shape index: {}]   ;;  %s3687_s5 = inlined_call_operand.vmem [shape: f32[8,16], index: 5, kind: input, shape index: {}]   ;;  %s3688_s6 = inlined_call_operand.vmem [shape: f32[8,1], index: 6, kind: input, shape index: {}]   ;;  %s3689_s7 = inlined_call_operand.vmem [shape: f32[8,200], index: 7, kind: input, shape index: {}]   ;;  %s3690_s8 = inlined_call_operand.vmem [shape: f32[8,1], index: 8, kind: input, shape index: {}]   ;;  %s3691_s9 = inlined_call_operand.vmem [shape: f32[25,64], index: 9, kind: input, shape index: {}]   ;;  %s3692_s10 = inlined_call_operand.vmem [shape: f32[2,8,128], index: 10, kind: output, shape index: {}]  }
   0x1 LB: > { %s2780_s14 = sadd.s32 4294967295, %s3122_s13   ;;  %p2784_p0 = scmp.ge.s32.totalorder %s3122_s13, 1  ;;  %s3122_s13 = sphi %s3213_s13, %s20_s13  }
   0x2   : > { %p312_p1 = scmp.lt.s32.totalorder %s3122_s13, 3 }
   0x4   : > { %p313_p2 = pnand %p2784_p0, %p312_p1 }
   0x5   : > { %p349_p3 = scmp.lt.s32.totalorder (!%p313_p2), %s2780_s14, 1  ;;  %v3124_v0 = vmov (!%p313_p2), 0.0   ;;  %v359_v1 = vld [vmem:[%s3684_s2] sm:$0xff] (!%p313_p2)  ;;  %vm3125_vm0 = vmmov (!%p313_p2), 0   ;;  %v3126_v2 = vmov (!%p313_p2), 0   ;;  %vm370_vm1 = vcmask (!%p313_p2), 23552  }
   0x6   : > { %316 = sbr.rel (%p313_p2) target bundleno = 1141 (0x475), region = 60  ;;  %445 = vmatprep.mubr.f32.mxu0 (!%p313_p2), %v3124_v0  ;;  %2924 = vmatprep.subr.mxu1 (!%p313_p2), %v3124_v0  ;;  %v1829_v3 = vld [vmem:[%s3686_s4] sm:$0xff] (!%p313_p2)  ;;  %vm374_vm2 = vcmask (!%p313_p2), 1042432   ;;  %v1830_v32 = vld [vmem:[%s3686_s4 + $0x8] sm:$0xff] (!%p313_p2)  ;;  %vm1841_vm3 = vcmask (!%p313_p2), 588800   ;;  %s3128_s19 = smov (!%p313_p2), 71  }
   0x7   : > { %2926 = vmatprep.mubr.msk.f32.mxu1 (!%p313_p2), %vm3125_vm0, %v3124_v0  ;;  %3105 = vset.pattern.permute.xlu0 (!%p313_p2), %v3126_v2  ;;  %v3242_v4 = vld [vmem:[%s3683_s1] sm:$0xff] (!%p313_p2)  ;;  %s3129_s20 = smov (!%p313_p2), 7   ;;  %s3130_s25 = smov (!%p313_p2), 72   ;;  %vm2013_vm4 = vcmask (!%p313_p2), 130048   ;;  %vm2161_vm5 = vcmask (!%p313_p2), 1048064   ;;  %vm2201_vm6 = vcmask (!%p313_p2), 523264  }
   0x8   : > { %362 = vperm.xlu0 (!%p313_p2), %3105, %v359_v1   ;;  %3106 = vset.pattern.permute.xlu1 (!%p313_p2), %v3126_v2  ;;  %v2007_v33 = vld [vmem:[%s3688_s6] sm:$0xff] (!%p313_p2)  ;;  %s3131_s26 = smov (!%p313_p2), 8   ;;  %s3132_s11 = smov (!%p313_p2), 9   ;;  %2164 = vst.msk [vmem:[#allocation3 + $0x10] sm:$0xff] (!%p313_p2), %vm2161_vm5, %v3124_v0  ;;  %2162 = vst.msk [vmem:[#allocation3] sm:$0xff] (!%p313_p2), %vm2161_vm5, %v3124_v0  ;;  %vm2220_vm7 = vcmask (!%p313_p2), 465920  }
   0x9   : > { %1838 = vperm.xlu1 (!%p313_p2), %3106, %v1830_v32   ;;  %s3142_s28 = smov (!%p313_p2), 25   ;;  %2163 = vst.msk [vmem:[#allocation3 + $0x8] sm:$0xff] (!%p313_p2), %vm2161_vm5, %v3124_v0  ;;  %2165 = vst.msk [vmem:[#allocation3 + $0x18] sm:$0xff] (!%p313_p2), %vm2161_vm5, %v3124_v0  ;;  %s3143_s12 = smov (!%p313_p2), 56   ;;  %vm2256_vm8 = vcmask (!%p313_p2), 457728   ;;  %vm2392_vm9 = vcmask (!%p313_p2), 400384  }
   0xa   : > { %2166 = vst.msk [vmem:[#allocation3 + $0x20] sm:$0xff] (!%p313_p2), %vm2161_vm5, %v3124_v0  ;;  %2167 = vst.msk [vmem:[#allocation3 + $0x28] sm:$0xff] (!%p313_p2), %vm2161_vm5, %v3124_v0  ;;  %s3145_s15 = smov (!%p313_p2), 120   ;;  %s3146_s16 = smov (!%p313_p2), 121   ;;  %vm2428_vm10 = vcmask (!%p313_p2), 392192   ;;  %vm2564_vm11 = vcmask (!%p313_p2), 334848  }
   0xb   : > { %2168 = vst.msk [vmem:[#allocation3 + $0x30] sm:$0xff] (!%p313_p2), %vm2161_vm5, %v3124_v0  ;;  %2169 = vst.msk [vmem:[#allocation3 + $0x38] sm:$0xff] (!%p313_p2), %vm2161_vm5, %v3124_v0  ;;  %s3150_s18 = smov (!%p313_p2), 48   ;;  %s3151_s21 = smov (!%p313_p2), 112   ;;  %vm2600_vm12 = vcmask (!%p313_p2), 326656  }
   0xc   : > { %1833 = vperm.xlu0 (!%p313_p2), %3105, %v1829_v3   ;;  %2170 = vst.msk [vmem:[#allocation3 + $0x40] sm:$0xff] (!%p313_p2), %vm2161_vm5, %v3124_v0  ;;  %2171 = vst.msk [vmem:[#allocation3 + $0x48] sm:$0xff] (!%p313_p2), %vm2161_vm5, %v3124_v0  ;;  %s3152_s23 = smov (!%p313_p2), 111   ;;  %s3156_s24 = smov (!%p313_p2), 104  }
   0xd   : > { %s3694_s14 = smov (!%p349_p3, %s2780_s14), 1  ;;  %2010 = vperm.xlu1 %3106, %v2007_v33   ;;  %2172 = vst.msk [vmem:[#allocation3 + $0x50] sm:$0xff] %vm2161_vm5, %v3124_v0  ;;  %2173 = vst.msk [vmem:[#allocation3 + $0x58] sm:$0xff] %vm2161_vm5, %v3124_v0 }
   0xe   : > { %s3062_s17 = smul.u32 108, %s3694_s14  ;;  %2174 = vst.msk [vmem:[#allocation3 + $0x60] sm:$0xff] %vm2161_vm5, %v3124_v0  ;;  %2175 = vst.msk [vmem:[#allocation3 + $0x68] sm:$0xff] %vm2161_vm5, %v3124_v0 }
   0xf   : > { %2176 = vst.msk [vmem:[#allocation3 + $0x70] sm:$0xff] %vm2161_vm5, %v3124_v0  ;;  %2177 = vst.msk [vmem:[#allocation3 + $0x78] sm:$0xff] %vm2161_vm5, %v3124_v0 }
  0x10   : > { %s3237_s22 = scalar_lea.vmem %s3682_s0, %s3062_s17  ;;  %2178 = vst.msk [vmem:[#allocation3 + $0x80] sm:$0xff] %vm2161_vm5, %v3124_v0  ;;  %2179 = vst.msk [vmem:[#allocation3 + $0x88] sm:$0xff] %vm2161_vm5, %v3124_v0  ;;  %s3147_s17 = smov 119  }
  0x11   : > { %v365_v5 = vld [vmem:[%s3237_s22] sm:$0x77]  ;;  %v2792_v8 = vld [vmem:[%s3237_s22 + $0xc] sm:$0x77]  ;;  %v366_v10 = vld [vmem:[%s3237_s22 + $0x8] sm:$0x7] }
  0x12   : > { %v2800_v6 = vld [vmem:[%s3237_s22 + $0x20] sm:$0x7]  ;;  %v369_v7 = vcombine.high %v365_v5, %v365_v5  ;;  %v2807_v9 = vld [vmem:[%s3237_s22 + $0x2c] sm:$0x7]  ;;  %v533_v11 = vcombine.high %v2792_v8, %v2792_v8  ;;  %v2814_v12 = vld [vmem:[%s3237_s22 + $0x38] sm:$0x7] }
  0x13   : > { %2925 = vmatpush3.msk.msra.mxu1 %vm374_vm2, %v2800_v6  ;;  %v2799_v13 = vld [vmem:[%s3237_s22 + $0x18] sm:$0x77]  ;;  %v2821_v14 = vld [vmem:[%s3237_s22 + $0x44] sm:$0x7]  ;;  %v2793_v15 = vld [vmem:[%s3237_s22 + $0x14] sm:$0x7] }
  0x14   : > { %2927 = vmatmul.mubr.msk.f32.vlgmr.msra.gmra.mrb[0].mxu1 %vm370_vm1, %v3242_v4  ;;  %2929 = vmatprep.subr.mxu1 %v3124_v0  ;;  %v692_v16 = vcombine.high %v2799_v13, %v2799_v13  ;;  %v2806_v17 = vld [vmem:[%s3237_s22 + $0x24] sm:$0x77]  ;;  %v2828_v18 = vld [vmem:[%s3237_s22 + $0x50] sm:$0x7]  ;;  %v2835_v21 = vld [vmem:[%s3237_s22 + $0x5c] sm:$0x7] }
  0x15   : > { %2787 = vmatprep.subr.msk.mxu0 %vm374_vm2, %v369_v7  ;;  %2930 = vmatpush3.msk.msra.mxu1 %vm374_vm2, %v2807_v9  ;;  %v851_v19 = vcombine.high %v2806_v17, %v2806_v17  ;;  %v2813_v20 = vld [vmem:[%s3237_s22 + $0x30] sm:$0x77]  ;;  %v2820_v23 = vld [vmem:[%s3237_s22 + $0x3c] sm:$0x77]  ;;  %v2842_v24 = vld [vmem:[%s3237_s22 + $0x68] sm:$0x7] }
  0x16   : > { %2788 = vmatpush1.msk.msra.mxu0 %vm374_vm2, %v365_v5  ;;  %2931 = vmatprep.mubr.msk.f32.mxu1 %vm3125_vm0, %v3124_v0  ;;  %v1010_v22 = vcombine.high %v2813_v20, %v2813_v20  ;;  %v1169_v25 = vcombine.high %v2820_v23, %v2820_v23  ;;  %v2827_v26 = vld [vmem:[%s3237_s22 + $0x48] sm:$0x77]  ;;  %v2834_v28 = vld [vmem:[%s3237_s22 + $0x54] sm:$0x77]  ;;  %v2841_v30 = vld [vmem:[%s3237_s22 + $0x60] sm:$0x77] }
  0x17   : > { %2789 = vmatmul.mubr.msk.f32.vlgmr.msra.gmra.mrb[0].mxu0 %vm370_vm1, %v3242_v4  ;;  %2914 = vmatprep.subr.mxu0 %v3124_v0  ;;  %v1328_v27 = vcombine.high %v2827_v26, %v2827_v26  ;;  %v1487_v29 = vcombine.high %v2834_v28, %v2834_v28  ;;  %v1646_v31 = vcombine.high %v2841_v30, %v2841_v30  ;;  %s3137_s22 = smov 17  }
  0x18   : > { %2915 = vmatpush3.msk.msra.mxu0 %vm374_vm2, %v366_v10  ;;  %2916 = vmatprep.mubr.msk.f32.mxu0 %vm3125_vm0, %v3124_v0  ;;  %2180 = vst.msk [vmem:[#allocation3 + $0x90] sm:$0xff] %vm2161_vm5, %v3124_v0  ;;  %2181 = vst.msk [vmem:[#allocation3 + $0x98] sm:$0xff] %vm2161_vm5, %v3124_v0 }
  0x19   : > { %2794 = vmatprep.subr.msk.mxu0 %vm374_vm2, %v533_v11  ;;  %2932 = vmatmul.mubr.msk.f32.vlgmr.msra.gmra.mrb[2].mxu1 %vm370_vm1, %v3242_v4  ;;  %2182 = vst.msk [vmem:[#allocation3 + $0xa0] sm:$0xff] %vm2161_vm5, %v3124_v0  ;;  %2183 = vst.msk [vmem:[#allocation3 + $0xa8] sm:$0xff] %vm2161_vm5, %v3124_v0 }
  0x1a   : > { %2934 = vmatprep.subr.mxu1 %v3124_v0  ;;  %2936 = vmatprep.mubr.msk.f32.mxu1 %vm3125_vm0, %v3124_v0  ;;  %2184 = vst.msk [vmem:[#allocation3 + $0xb0] sm:$0xff] %vm2161_vm5, %v3124_v0  ;;  %2185 = vst.msk [vmem:[#allocation3 + $0xb8] sm:$0xff] %vm2161_vm5, %v3124_v0 }
  0x1b   : > { %2917 = vmatmul.mubr.msk.f32.vlgmr.msra.gmra.mrb[2].mxu0 %vm370_vm1, %v3242_v4  ;;  %2935 = vmatpush3.msk.msra.mxu1 %vm374_vm2, %v2814_v12  ;;  %2186 = vst.msk [vmem:[#allocation3 + $0xc0] sm:$0xff] %vm2161_vm5, %v3124_v0 }
  0x1c   : > { %2795 = vmatpush1.msk.msra.mxu0 %vm374_vm2, %v2792_v8  ;;  %604 = vmatprep.mubr.f32.mxu0 %v3124_v0 }
  0x1d   : > { %2919 = vmatprep.subr.mxu0 %v3124_v0  ;;  %2937 = vmatmul.mubr.msk.f32.vlgmr.msra.gmra.mrb[4].mxu1 %vm370_vm1, %v3242_v4 }
  0x1e   : > { %2939 = vmatprep.subr.mxu1 %v3124_v0  ;;  %2941 = vmatprep.mubr.msk.f32.mxu1 %vm3125_vm0, %v3124_v0 }
  0x1f   : > { %2796 = vmatmul.mubr.msk.f32.vlgmr.msra.gmra.mrb[4].mxu0 %vm370_vm1, %v3242_v4  ;;  %2940 = vmatpush3.msk.msra.mxu1 %vm374_vm2, %v2821_v14 }
  0x20   : > { %2920 = vmatpush3.msk.msra.mxu0 %vm374_vm2, %v2793_v15  ;;  %2921 = vmatprep.mubr.msk.f32.mxu0 %vm3125_vm0, %v3124_v0 }
  0x21   : > { %2801 = vmatprep.subr.msk.mxu0 %vm374_vm2, %v692_v16  ;;  %2942 = vmatmul.mubr.msk.f32.vlgmr.msra.gmra.mrb[6].mxu1 %vm370_vm1, %v3242_v4 }
  0x22   : > { %2944 = vmatprep.subr.mxu1 %v3124_v0  ;;  %2946 = vmatprep.mubr.msk.f32.mxu1 %vm3125_vm0, %v3124_v0 }
  0x23   : > { %2922 = vmatmul.mubr.msk.f32.vlgmr.msra.gmra.mrb[6].mxu0 %vm370_vm1, %v3242_v4  ;;  %2945 = vmatpush3.msk.msra.mxu1 %vm374_vm2, %v2828_v18 }
  0x24   : > { %2802 = vmatpush1.msk.msra.mxu0 %vm374_vm2, %v2799_v13  ;;  %763 = vmatprep.mubr.f32.mxu0 %v3124_v0 }
  0x25   : > { %2808 = vmatprep.subr.msk.mxu0 %vm374_vm2, %v851_v19  ;;  %2947 = vmatmul.mubr.msk.f32.vlgmr.msra.gmra.mrb[8].mxu1 %vm370_vm1, %v3242_v4 }
  0x26   : > { %2949 = vmatprep.subr.mxu1 %v3124_v0  ;;  %2951 = vmatprep.mubr.msk.f32.mxu1 %vm3125_vm0, %v3124_v0 }
  0x27   : > { %2803 = vmatmul.mubr.msk.f32.vlgmr.msra.gmra.mrb[8].mxu0 %vm370_vm1, %v3242_v4  ;;  %2950 = vmatpush3.msk.msra.mxu1 %vm374_vm2, %v2835_v21 }
  0x28   : > { %2809 = vmatpush1.msk.msra.mxu0 %vm374_vm2, %v2806_v17  ;;  %922 = vmatprep.mubr.f32.mxu0 %v3124_v0 }
  0x29   : > { %2815 = vmatprep.subr.msk.mxu0 %vm374_vm2, %v1010_v22  ;;  %2952 = vmatmul.mubr.msk.f32.vlgmr.msra.gmra.mrb[10].mxu1 %vm370_vm1, %v3242_v4 }
  0x2a   : > { %2954 = vmatprep.subr.mxu1 %v3124_v0  ;;  %2956 = vmatprep.mubr.msk.f32.mxu1 %vm3125_vm0, %v3124_v0 }
  0x2b   : > { %2810 = vmatmul.mubr.msk.f32.vlgmr.msra.gmra.mrb[10].mxu0 %vm370_vm1, %v3242_v4  ;;  %2955 = vmatpush3.msk.msra.mxu1 %vm374_vm2, %v2842_v24 }
  0x2c   : > { %2816 = vmatpush1.msk.msra.mxu0 %vm374_vm2, %v2813_v20  ;;  %1081 = vmatprep.mubr.f32.mxu0 %v3124_v0 }
  0x2d   : > { %2822 = vmatprep.subr.msk.mxu0 %vm374_vm2, %v1169_v25  ;;  %2957 = vmatmul.mubr.msk.f32.vlgmr.msra.gmra.mrb[12].mxu1 %vm370_vm1, %v3242_v4 }
  0x2e   : > { %2081 = vmatprep.mubr.f32.mxu1 %v3124_v0 }
  0x2f   : > { %2817 = vmatmul.mubr.msk.f32.vlgmr.msra.gmra.mrb[12].mxu0 %vm370_vm1, %v3242_v4 }
  0x30   : > { %2823 = vmatpush1.msk.msra.mxu0 %vm374_vm2, %v2820_v23  ;;  %1240 = vmatprep.mubr.f32.mxu0 %v3124_v0 }
  0x31   : > { %2829 = vmatprep.subr.msk.mxu0 %vm374_vm2, %v1328_v27 }
  0x33   : > { %2824 = vmatmul.mubr.msk.f32.vlgmr.msra.gmra.mrb[14].mxu0 %vm370_vm1, %v3242_v4 }
  0x34   : > { %2830 = vmatpush1.msk.msra.mxu0 %vm374_vm2, %v2827_v26  ;;  %1399 = vmatprep.mubr.f32.mxu0 %v3124_v0 }
  0x35   : > { %2836 = vmatprep.subr.msk.mxu0 %vm374_vm2, %v1487_v29 }
  0x37   : > { %2831 = vmatmul.mubr.msk.f32.vlgmr.msra.gmra.mrb[16].mxu0 %vm370_vm1, %v3242_v4 }
  0x38   : > { %2837 = vmatpush1.msk.msra.mxu0 %vm374_vm2, %v2834_v28  ;;  %1558 = vmatprep.mubr.f32.mxu0 %v3124_v0 }
  0x39   : > { %2843 = vmatprep.subr.msk.mxu0 %vm374_vm2, %v1646_v31 }
  0x3b   : > { %2838 = vmatmul.mubr.msk.f32.vlgmr.msra.gmra.mrb[18].mxu0 %vm370_vm1, %v3242_v4 }
  0x3c   : > { %2844 = vmatpush1.msk.msra.mxu0 %vm374_vm2, %v2841_v30  ;;  %1717 = vmatprep.mubr.f32.mxu0 %v3124_v0 }
  0x3f   : > { %2845 = vmatmul.mubr.msk.f32.vlgmr.msra.gmra.mrb[20].mxu0 %vm370_vm1, %v3242_v4 }
  0x40   : > { %1912 = vmatprep.mubr.f32.mxu0 %v3124_v0 }
  0x87   : > { %v3365_v35 = vpop.permute.xlu0 %362 }
  0xe7   : > { %v836_v34 = vpop.f32.mrb[0].mxu1 }
  0xe8   : > { %v2928_v36 = vpop.f32.mrb[1].mxu1  ;;  %v837_v37 = vadd.f32 %v836_v34, %v3365_v35 }
  0xea   : > { %v447_v38 = vpop.f32.mrb[0].mxu0  ;;  %v842_v41 = vmax.f32 %v837_v37, 0.0 }
  0xeb   : > { %v449_v39 = vpop.f32.mrb[1].mxu0  ;;  %v448_v47 = vadd.f32 %v447_v38, %v3365_v35 }
  0xec   : > { %v995_v40 = vpop.f32.mrb[2].mxu1  ;;  %v450_v52 = vadd.f32 %v449_v39, %v3365_v35 }
  0xed   : > { %v996_v42 = vadd.f32 %v995_v40, %v3365_v35  ;;  %v2933_v43 = vpop.f32.mrb[3].mxu1  ;;  %v522_v56 = vmax.f32 %v448_v47, 0.0 }
  0xee   : > { %v518_v44 = vpop.f32.mrb[2].mxu0  ;;  %v523_v1 = vmax.f32 %v450_v52, 0.0 }
  0xef   : > { %v2918_v45 = vpop.f32.mrb[3].mxu0  ;;  %v1001_v46 = vmax.f32 %v996_v42, 0.0  ;;  %v519_v59 = vadd.f32 %v518_v44, %v3365_v35 }
  0xf0   : > { %v1154_v48 = vpop.f32.mrb[4].mxu1 }
  0xf1   : > { %v3370_v49 = vpack.c.bf16 %v1001_v46, %v842_v41  ;;  %v1155_v50 = vadd.f32 %v1154_v48, %v3365_v35  ;;  %v2938_v51 = vpop.f32.mrb[5].mxu1  ;;  %v524_v10 = vmax.f32 %v519_v59, 0.0 }
  0xf2   : > { %v606_v53 = vpop.f32.mrb[4].mxu0 }
  0xf3   : > { %v607_v54 = vadd.f32 %v606_v53, %v3365_v35  ;;  %v608_v55 = vpop.f32.mrb[5].mxu0  ;;  %v1160_v61 = vmax.f32 %v1155_v50, 0.0 }
  0xf4   : > { %v609_v57 = vadd.f32 %v608_v55, %v3365_v35  ;;  %v1313_v58 = vpop.f32.mrb[6].mxu1 }
  0xf5   : > { %v681_v60 = vmax.f32 %v607_v54, 0.0  ;;  %v1314_v62 = vadd.f32 %v1313_v58, %v3365_v35  ;;  %v2943_v63 = vpop.f32.mrb[7].mxu1 }
  0xf6   : > { %v682_v2 = vmax.f32 %v609_v57, 0.0  ;;  %v677_v3 = vpop.f32.mrb[6].mxu0 }
  0xf7   : > { %v2989_v4 = vpack.c.bf16 %v681_v60, %v522_v56  ;;  %v678_v5 = vadd.f32 %v677_v3, %v3365_v35  ;;  %v2923_v6 = vpop.f32.mrb[7].mxu0  ;;  %v1319_v7 = vmax.f32 %v1314_v62, 0.0 }
  0xf8   : > { %v2987_v8 = vpack.c.bf16 %v682_v2, %v523_v1  ;;  %v1472_v9 = vpop.f32.mrb[8].mxu1 }
  0xf9   : > { %v683_v11 = vmax.f32 %v678_v5, 0.0  ;;  %v3379_v12 = vpack.c.bf16 %v1319_v7, %v1160_v61  ;;  %v1473_v13 = vadd.f32 %v1472_v9, %v3365_v35  ;;  %v2948_v14 = vpop.f32.mrb[9].mxu1 }
  0xfa   : > { %v765_v15 = vpop.f32.mrb[8].mxu0  ;;  %2988 = vmatprep.subr.bf16.mxu0 %v2987_v8 }
  0xfb   : > { %v3382_v16 = vpack.c.bf16 %v683_v11, %v524_v10  ;;  %v767_v17 = vpop.f32.mrb[9].mxu0  ;;  %2990 = vmatpush1.bf16.msra.mxu0 %v2989_v4  ;;  %v766_v19 = vadd.f32 %v765_v15, %v3365_v35  ;;  %v1478_v20 = vmax.f32 %v1473_v13, 0.0  ;;  %v1800_v11 = vld [vmem:[%s3685_s3] sm:$0xff]  ;;  %v1801_v13 = vld [vmem:[%s3685_s3 + $0x8] sm:$0xff] }
  0xfc   : > { %v1631_v18 = vpop.f32.mrb[10].mxu1  ;;  %v768_v23 = vadd.f32 %v767_v17, %v3365_v35  ;;  %v2856_v17 = vld [vmem:[%s3691_s9 + $0x2] ss:$0 sm:$0xff] }
  0xfd   : > { %v1632_v21 = vadd.f32 %v1631_v18, %v3365_v35  ;;  %v2953_v22 = vpop.f32.mrb[11].mxu1  ;;  %v840_v30 = vmax.f32 %v766_v19, 0.0  ;;  %v2858_v18 = vld [vmem:[%s3691_s9 + $0x4] ss:$0 sm:$0xff]  ;;  %v2859_v19 = vld [vmem:[%s3691_s9 + $0x5] ss:$0 sm:$0xff] }
  0xfe   : > { %v924_v24 = vpop.f32.mrb[10].mxu0  ;;  %v841_v34 = vmax.f32 %v768_v23, 0.0  ;;  %v2862_v22 = vld [vmem:[%s3691_s9 + $0x8] ss:$0 sm:$0xff]  ;;  %v2863_v23 = vld [vmem:[%s3691_s9 + $0x9] ss:$0 sm:$0xff] }
  0xff   : > { %v925_v25 = vadd.f32 %v924_v24, %v3365_v35  ;;  %v926_v26 = vpop.f32.mrb[11].mxu0  ;;  %v1637_v27 = vmax.f32 %v1632_v21, 0.0  ;;  %v2861_v21 = vld [vmem:[%s3691_s9 + $0x7] ss:$0 sm:$0xff]  ;;  %v2865_v24 = vld [vmem:[%s3691_s9 + $0xb] ss:$0 sm:$0xff] }
 0x100   : > { %v927_v28 = vadd.f32 %v926_v26, %v3365_v35  ;;  %v3389_v29 = vpop.f32.mrb[12].mxu1  ;;  %v2867_v26 = vld [vmem:[%s3691_s9 + $0xd] ss:$0 sm:$0xff] }
 0x101   : > { %v999_v31 = vmax.f32 %v925_v25, 0.0  ;;  %v3391_v32 = vpack.c.bf16 %v1637_v27, %v1478_v20  ;;  %v2958_v33 = vpop.f32.mrb[13].mxu1  ;;  %v1791_v14 = vadd.f32 %v3389_v29, %v3365_v35  ;;  %v2860_v20 = vld [vmem:[%s3691_s9 + $0x6] ss:$0 sm:$0xff]  ;;  %v2864_v25 = vld [vmem:[%s3691_s9 + $0xa] ss:$0 sm:$0xff] }
 0x102   : > { %v1000_v36 = vmax.f32 %v927_v28, 0.0  ;;  %v1083_v37 = vpop.f32.mrb[12].mxu0  ;;  %v2866_v27 = vld [vmem:[%s3691_s9 + $0xc] ss:$0 sm:$0xff]  ;;  %v2868_v28 = vld [vmem:[%s3691_s9 + $0xe] ss:$0 sm:$0xff] }
 0x103   : > { %v2993_v38 = vpack.c.bf16 %v999_v31, %v840_v30  ;;  %v1085_v39 = vpop.f32.mrb[13].mxu0  ;;  %v1084_v41 = vadd.f32 %v1083_v37, %v3365_v35  ;;  %v1796_v15 = vmax.f32 %v1791_v14, 0.0  ;;  %v2869_v29 = vld [vmem:[%s3691_s9 + $0xf] ss:$0 sm:$0xff]  ;;  %v2870_v30 = vld [vmem:[%s3691_s9 + $0x10] ss:$0 sm:$0xff] }
 0x104   : > { %v2991_v40 = vpack.c.bf16 %v1000_v36, %v841_v34  ;;  %v1086_v42 = vadd.f32 %v1085_v39, %v3365_v35  ;;  %v2871_v31 = vld [vmem:[%s3691_s9 + $0x11] ss:$0 sm:$0xff]  ;;  %v2873_v33 = vld [vmem:[%s3691_s9 + $0x13] ss:$0 sm:$0xff]  ;;  %v2875_v34 = vld [vmem:[%s3691_s9 + $0x15] ss:$0 sm:$0xff] }
 0x105   : > { %v1158_v47 = vmax.f32 %v1084_v41, 0.0  ;;  %v2874_v36 = vld [vmem:[%s3691_s9 + $0x14] ss:$0 sm:$0xff]  ;;  %v2877_v37 = vld [vmem:[%s3691_s9 + $0x17] ss:$0 sm:$0xff] }
 0x106   : > { %v1242_v43 = vpop.f32.mrb[14].mxu0  ;;  %2992 = vmatprep.subr.bf16.mxu0 %v2991_v40  ;;  %v1159_v50 = vmax.f32 %v1086_v42, 0.0  ;;  %v2878_v39 = vld [vmem:[%s3691_s9 + $0x18] ss:$0 sm:$0xff]  ;;  %v1834_v42 = vpop.permute.xlu0 %1833 }
 0x107   : > { %v1243_v44 = vadd.f32 %v1242_v43, %v3365_v35  ;;  %v1244_v45 = vpop.f32.mrb[15].mxu0  ;;  %2994 = vmatpush1.bf16.msra.mxu0 %v2993_v38  ;;  %v2876_v38 = vld [vmem:[%s3691_s9 + $0x16] ss:$0 sm:$0xff] }
 0x108   : > { %v1245_v46 = vadd.f32 %v1244_v45, %v3365_v35 }
 0x109   : > { %v1317_v48 = vmax.f32 %v1243_v44, 0.0  ;;  %v1839_v44 = vpop.permute.xlu1 %1838 }
 0x10a   : > { %v1318_v51 = vmax.f32 %v1245_v46, 0.0  ;;  %v1401_v52 = vpop.f32.mrb[16].mxu0 }
 0x10b   : > { %v2997_v53 = vpack.c.bf16 %v1317_v48, %v1158_v47  ;;  %v1403_v54 = vpop.f32.mrb[17].mxu0  ;;  %v1402_v56 = vadd.f32 %v1401_v52, %v3365_v35 }
 0x10c   : > { %v2995_v55 = vpack.c.bf16 %v1318_v51, %v1159_v50  ;;  %v1404_v57 = vadd.f32 %v1403_v54, %v3365_v35 }
 0x10d   : > { %v1476_v62 = vmax.f32 %v1402_v56, 0.0 }
 0x10e   : > { %v1560_v58 = vpop.f32.mrb[18].mxu0  ;;  %2996 = vmatprep.subr.bf16.mxu0 %v2995_v55  ;;  %v1477_v1 = vmax.f32 %v1404_v57, 0.0  ;;  %v2006_v57 = vld [vmem:[%s3687_s5] sm:$0xff] }
 0x10f   : > { %v1561_v59 = vadd.f32 %v1560_v58, %v3365_v35  ;;  %v1562_v60 = vpop.f32.mrb[19].mxu0  ;;  %2998 = vmatpush1.bf16.msra.mxu0 %v2997_v53 }
 0x110   : > { %v1563_v61 = vadd.f32 %v1562_v60, %v3365_v35 }
 0x111   : > { %v1635_v63 = vmax.f32 %v1561_v59, 0.0 }
 0x112   : > { %v1636_v2 = vmax.f32 %v1563_v61, 0.0  ;;  %v1719_v3 = vpop.f32.mrb[20].mxu0 }
 0x113   : > { %v3001_v4 = vpack.c.bf16 %v1635_v63, %v1476_v62  ;;  %v1721_v5 = vpop.f32.mrb[21].mxu0  ;;  %v1720_v8 = vadd.f32 %v1719_v3, %v3365_v35 }
 0x114   : > { %v2999_v6 = vpack.c.bf16 %v1636_v2, %v1477_v1  ;;  %v1722_v7 = vadd.f32 %v1721_v5, %v3365_v35  ;;  %v2855_v35 = vld [vmem:[%s3691_s9 + $0x1] ss:$0 sm:$0xff]  ;;  %v3506_v2 = vpop.permute.xlu1 %2010 }
 0x115   : > { %v1794_v10 = vmax.f32 %v1720_v8, 0.0  ;;  %2209 = vrot.lane.b32.xlu0 %v2855_v35, %s3128_s19 }
 0x116   : > { %v1795_v9 = vmax.f32 %v1722_v7, 0.0  ;;  %3000 = vmatprep.subr.bf16.mxu0 %v2999_v6 }
 0x117   : > { %3002 = vmatpush1.bf16.msra.mxu0 %v3001_v4 }
 0x118   : > { %1864 = vmatprep.subr.mxu0 %v1795_v9 }
 0x11b   : > { %1865 = vmatpush1.msra.mxu0 %v1794_v10 }
 0x11c   : > { %2848 = vmatmul.mubr.msk.f32.vlgmr.msra.gmra.mrb[22].mxu0 %vm1841_vm3, %v1800_v11  ;;  %3004 = vmatprep.subr.bf16.mxu0 %v3382_v16 }
 0x11d   : > { %3006 = vmatpush3.bf16.msra.mxu0 %v3382_v16  ;;  %1918 = vmatprep.mubr.f32.mxu0 %v3124_v0  ;;  %v2857_v16 = vld [vmem:[%s3691_s9 + $0x3] ss:$0 sm:$0xff] }
 0x11e   : > { %3008 = vmatprep.subr.bf16.mxu0 %v3370_v49  ;;  %2245 = vrot.lane.b32.xlu0 %v2857_v16, %s3130_s25 }
 0x120   : > { %2849 = vmatmul.mubr.msk.f32.gmra.mrb[24].mxu0 %vm1841_vm3, %v1801_v13 }
 0x121   : > { %3010 = vmatpush3.bf16.msra.mxu0 %v3370_v49  ;;  %2977 = vmatprep.mubr.msk.f32.mxu0 %vm1841_vm3, %v1800_v11  ;;  %v3127_v49 = vmov 0.0|0.0  }
 0x122   : > { %3012 = vmatprep.subr.bf16.mxu0 %v3379_v12  ;;  %2266 = vrot.lane.b32.xlu0 %v2858_v18, %s3132_s11 }
 0x125   : > { %3014 = vmatpush3.bf16.msra.mxu0 %v3379_v12  ;;  %v2854_v12 = vld [vmem:[%s3691_s9] ss:$0 sm:$0xff] }
 0x126   : > { %3016 = vmatprep.subr.bf16.mxu0 %v3391_v32  ;;  %2193 = vrot.lane.b32.xlu1 %v2854_v12, %s3129_s20 }
 0x127   : > { %2296 = vrot.lane.b32.xlu0 %v2860_v20, %s3128_s19  ;;  %s3133_s19 = smov 79  }
 0x129   : > { %3018 = vmatpush3.bf16.msra.mxu0 %v3391_v32  ;;  %v2872_v32 = vld [vmem:[%s3691_s9 + $0x12] ss:$0 sm:$0xff] }
 0x12a   : > { %2975 = vmatprep.subr.mxu0 %v1796_v15  ;;  %2230 = vrot.lane.b32.xlu1 %v2856_v17, %s3131_s26 }
 0x12b   : > { %2331 = vrot.lane.b32.xlu0 %v2862_v22, %s3130_s25  ;;  %s3135_s25 = smov 80  }
 0x12d   : > { %2976 = vmatpush3.msra.mxu0 %v1796_v15 }
 0x12e   : > { %2978 = vmatmul.mubr.msk.f32.vlgmr.msra.gmra.mrb[26].mxu0 %vm1841_vm3, %v1801_v13  ;;  %3023 = vmatprep.subr.bf16.mxu0 %v3127_v49 }
 0x12f   : > { %2984 = vmatprep.mubr.msk.f32.mxu0 %vm3125_vm0, %v3124_v0  ;;  %2281 = vrot.lane.b32.xlu1 %v2859_v19, %s3129_s20  ;;  %s3153_s20 = smov 41  }
 0x130   : > { %2381 = vrot.lane.b32.xlu0 %v2865_v24, %s3133_s19 }
 0x133   : > { %2316 = vrot.lane.b32.xlu1 %v2861_v21, %s3131_s26  ;;  %s3134_s26 = smov 15  }
 0x134   : > { %2417 = vrot.lane.b32.xlu0 %v2867_v26, %s3135_s25 }
 0x137   : > { %2351 = vrot.lane.b32.xlu1 %v2863_v23, %s3132_s11  ;;  %s3136_s11 = smov 16  }
 0x138   : > { %2438 = vrot.lane.b32.xlu0 %v2868_v28, %s3137_s22 }
 0x13b   : > { %2366 = vrot.lane.b32.xlu1 %v2864_v25, %s3134_s26 }
 0x13c   : > { %2468 = vrot.lane.b32.xlu0 %v2870_v30, %s3133_s19  ;;  %s3138_s19 = smov 87  }
 0x13f   : > { %2402 = vrot.lane.b32.xlu1 %v2866_v27, %s3136_s11 }
 0x140   : > { %2503 = vrot.lane.b32.xlu0 %v2872_v32, %s3135_s25  ;;  %s3140_s25 = smov 88  }
 0x143   : > { %2453 = vrot.lane.b32.xlu1 %v2869_v29, %s3134_s26  ;;  %s3144_s26 = smov 57  }
 0x144   : > { %2553 = vrot.lane.b32.xlu0 %v2875_v34, %s3138_s19  ;;  %s3148_s19 = smov 49  }
 0x147   : > { %2488 = vrot.lane.b32.xlu1 %v2871_v31, %s3136_s11  ;;  %s3139_s11 = smov 23  }
 0x148   : > { %2589 = vrot.lane.b32.xlu0 %v2877_v37, %s3140_s25  ;;  %s3154_s25 = smov 40  }
 0x14b   : > { %2523 = vrot.lane.b32.xlu1 %v2873_v33, %s3137_s22  ;;  %s3141_s22 = smov 24  }
 0x14c   : > { %2610 = vrot.lane.b32.xlu0 %v2878_v39, %s3142_s28 }
 0x14f   : > { %2538 = vrot.lane.b32.xlu1 %v2874_v36, %s3139_s11  ;;  %s3149_s11 = smov 113  }
 0x153   : > { %2574 = vrot.lane.b32.xlu1 %v2876_v38, %s3141_s22  ;;  %s3155_s22 = smov 105  }
 0x187   : > { %v2210_v3 = vpop.permute.xlu0 %2209 }
 0x190   : > { %v3508_v5 = vpop.permute.xlu0 %2245 }
 0x194   : > { %v2267_v7 = vpop.permute.xlu0 %2266 }
 0x198   : > { %v2194_v4 = vpop.permute.xlu1 %2193 }
 0x199   : > { %v2297_v14 = vpop.permute.xlu0 %2296 }
 0x19c   : > { %v2231_v6 = vpop.permute.xlu1 %2230 }
 0x19d   : > { %v2332_v20 = vpop.permute.xlu0 %2331 }
 0x1a1   : > { %v2282_v11 = vpop.permute.xlu1 %2281 }
 0x1a2   : > { %v2382_v26 = vpop.permute.xlu0 %2381 }
 0x1a5   : > { %v2317_v16 = vpop.permute.xlu1 %2316 }
 0x1a6   : > { %v2418_v39 = vpop.permute.xlu0 %2417 }
 0x1a9   : > { %v2352_v24 = vpop.permute.xlu1 %2351 }
 0x1ad   : > { %v2367_v29 = vpop.permute.xlu1 %2366 }
 0x1ef   : > { %v1914_v40 = vpop.f32.mrb[22].mxu0 }
 0x1f0   : > { %v1916_v41 = vpop.f32.mrb[23].mxu0  ;;  %v1915_v43 = vadd.f32 %v1914_v40, %v1834_v42 }
 0x1f1   : > { %v1917_v45 = vadd.f32 %v1916_v41, %v1834_v42 }
 0x1f2   : > { %v2000_v51 = vmax.f32 %v1915_v43, 0.0  ;;  %v2439_v43 = vpop.permute.xlu0 %2438 }
 0x1f3   : > { %v1920_v46 = vpop.f32.mrb[24].mxu0  ;;  %v2001_v53 = vmax.f32 %v1917_v45, 0.0 }
 0x1f4   : > { %v1921_v47 = vadd.f32 %v1920_v46, %v1839_v44  ;;  %v1922_v48 = vpop.f32.mrb[25].mxu0 }
 0x1f5   : > { %v1923_v50 = vadd.f32 %v1922_v48, %v1839_v44 }
 0x1f6   : > { %v2003_v52 = vmax.f32 %v1921_v47, 0.0 }
 0x1f7   : > { %v2004_v54 = vmax.f32 %v1923_v50, 0.0  ;;  %v2469_v50 = vpop.permute.xlu0 %2468 }
 0x1f8   : > { %v3021_v55 = vpack.c.bf16 %v2003_v52, %v2000_v51 }
 0x1f9   : > { %v3019_v56 = vpack.c.bf16 %v2004_v54, %v2001_v53 }
 0x1fb   : > { %3020 = vmatprep.subr.bf16.mxu1 %v3019_v56  ;;  %v2504_v54 = vpop.permute.xlu0 %2503 }
 0x1fc   : > { %3022 = vmatpush1.bf16.msra.mxu1 %v3021_v55 }
 0x1fd   : > { %3026 = vmatprep.subr.bf16.mxu1 %v3127_v49 }
 0x1ff   : > { %2852 = vmatmul.mubr.msk.f32.vlgmr.msra.gmra.mrb[14].mxu1 %vm2013_vm4, %v2006_v57 }
 0x201   : > { %v2979_v58 = vpop.f32.mrb[26].mxu0 }
 0x202   : > { %v1997_v59 = vadd.f32 %v2979_v58, %v1839_v44  ;;  %v1991_v60 = vpop.f32.mrb[27].mxu0 }
 0x203   : > { %v1992_v61 = vadd.f32 %v1991_v60, %v1834_v42  ;;  %v2403_v42 = vpop.permute.xlu1 %2402  ;;  %v2554_v60 = vpop.permute.xlu0 %2553 }
 0x204   : > { %v2005_v62 = vmax.f32 %v1997_v59, 0.0 }
 0x205   : > { %v2002_v63 = vmax.f32 %v1992_v61, 0.0 }
 0x207   : > { %v3024_v1 = vpack.c.bf16 %v2005_v62, %v2002_v63  ;;  %v2454_v48 = vpop.permute.xlu1 %2453 }
 0x209   : > { %3025 = vmatpush3.bf16.msra.mxu0 %v3024_v1 }
 0x20b   : > { %v2489_v53 = vpop.permute.xlu1 %2488 }
 0x20c   : > { %2985 = vmatmul.mubr.msk.f32.vlgmr.msra.gmra.mrb[28].mxu0 %vm2013_vm4, %v2006_v57 }
 0x20f   : > { %v2524_v59 = vpop.permute.xlu1 %2523 }
 0x213   : > { %v2539_v63 = vpop.permute.xlu1 %2538 }
 0x2d2   : > { %v2083_v8 = vpop.f32.mrb[14].mxu1 }
 0x2d3   : > { %v2084_v9 = vadd.f32 %v2083_v8, %v3506_v2  ;;  %v2085_v10 = vpop.f32.mrb[15].mxu1 }
 0x2d4   : > { %v2086_v15 = vadd.f32 %v2085_v10, %v3506_v2  ;;  %v2646_v10 = vld [vmem:[%s3690_s8] sm:$0xff] }
 0x2d5   : > { %v3561_v13 = vmax.f32 %v2084_v9, 0.0 }
 0x2d6   : > { %v3569_v17 = vmax.f32 %v2086_v15, 0.0 }
 0x2d7   : > { %v2248_v35 = vmul.f32 %v3508_v5, %v3561_v13  ;;  %v2212_v12 = vmul.f32 %v2210_v3, %v3561_v13  ;;  %v2233_v18 = vmul.f32 %v2231_v6, %v3561_v13  ;;  %v2196_v19 = vmul.f32 %v2194_v4, %v3561_v13  ;;  %v2575_v6 = vpop.permute.xlu1 %2574 }
 0x2d8   : > { %v2213_v22 = vmul.f32 %v2210_v3, %v3569_v17  ;;  %v2269_v23 = vmul.f32 %v2267_v7, %v3561_v13  ;;  %v2284_v27 = vmul.f32 %v2282_v11, %v3569_v17  ;;  %v2384_v28 = vmul.f32 %v2382_v26, %v3561_v13  ;;  %v2590_v3 = vpop.permute.xlu0 %2589 }
 0x2d9   : > { %2252 = vrot.lane.b32.xlu0 %v2248_v35, %s3143_s12  ;;  %2216 = vrot.lane.b32.xlu1 %v2212_v12, %s3144_s26  ;;  %v2334_v30 = vmul.f32 %v2332_v20, %v3569_v17  ;;  %v2369_v31 = vmul.f32 %v2367_v29, %v3561_v13  ;;  %v2354_v33 = vmul.f32 %v2352_v24, %v3569_v17 }
 0x2da   : > { %v2249_v34 = vmul.f32 %v3508_v5, %v3569_v17  ;;  %v2385_v37 = vmul.f32 %v2382_v26, %v3569_v17  ;;  %v2299_v38 = vmul.f32 %v2297_v14, %v3569_v17  ;;  %v2319_v41 = vmul.f32 %v2317_v16, %v3569_v17 }
 0x2db   : > { %v2420_v44 = vmul.f32 %v2418_v39, %v3561_v13  ;;  %v2421_v45 = vmul.f32 %v2418_v39, %v3569_v17  ;;  %v2405_v46 = vmul.f32 %v2403_v42, %v3561_v13  ;;  %v2456_v51 = vmul.f32 %v2454_v48, %v3569_v17 }
 0x2dc   : > { %v2441_v52 = vmul.f32 %v2439_v43, %v3561_v13  ;;  %v2506_v55 = vmul.f32 %v2504_v54, %v3569_v17  ;;  %v2471_v56 = vmul.f32 %v2469_v50, %v3569_v17  ;;  %v2491_v58 = vmul.f32 %v2489_v53, %v3569_v17  ;;  %v2611_v9 = vpop.permute.xlu0 %2610 }
 0x2dd   : > { %2235 = vrot.lane.b32.xlu0 %v2233_v18, %s3145_s15  ;;  %2198 = vrot.lane.b32.xlu1 %v2196_v19, %s3146_s16  ;;  %v2526_v61 = vmul.f32 %v2524_v59, %v3569_v17  ;;  %v2556_v62 = vmul.f32 %v2554_v60, %v3561_v13  ;;  %v2557_v1 = vmul.f32 %v2554_v60, %v3569_v17 }
 0x2de   : > { %v2592_v4 = vmul.f32 %v2590_v3, %v3561_v13  ;;  %v2541_v5 = vmul.f32 %v2539_v63, %v3561_v13  ;;  %v2577_v7 = vmul.f32 %v2575_v6, %v3561_v13  ;;  %v2593_v8 = vmul.f32 %v2590_v3, %v3569_v17 }
 0x2df   : > { %v2154_v21 = vpop.f32.mrb[28].mxu0  ;;  %v2613_v11 = vmul.f32 %v2611_v9, %v3561_v13 }
 0x2e0   : > { %v2986_v25 = vpop.f32.mrb[29].mxu0  ;;  %v2155_v32 = vadd.f32 %v2154_v21, %v3506_v2 }
 0x2e1   : > { %2218 = vrot.lane.b32.xlu0 %v2213_v22, %s3144_s26  ;;  %2271 = vrot.lane.b32.xlu1 %v2269_v23, %s3147_s17 }
 0x2e2   : > { %v2160_v36 = vmax.f32 %v2155_v32, 0.0 }
 0x2e4   : > { %v2300_v40 = vmul.f32 %v2297_v14, %v2160_v36  ;;  %v2335_v47 = vmul.f32 %v2332_v20, %v2160_v36  ;;  %v2472_v57 = vmul.f32 %v2469_v50, %v2160_v36  ;;  %v2507_v2 = vmul.f32 %v2504_v54, %v2160_v36  ;;  %v2620_v14 = vld [vmem:[%s3689_s7 + $0x8] sm:$0xff] }
 0x2e5   : > { %2286 = vrot.lane.b32.xlu0 %v2284_v27, %s3146_s16  ;;  %2388 = vrot.lane.b32.xlu1 %v2384_v28, %s3148_s19  ;;  %s2786_s16 = sshll.u32 %s3694_s14, 3 }
 0x2e6   : > { %2879 = vmatprep.mubr.msk.f32.mxu1 %vm1841_vm3, %v2620_v14 }
 0x2e9   : > { %2338 = vrot.lane.b32.xlu0 %v2334_v30, %s3143_s12  ;;  %2371 = vrot.lane.b32.xlu1 %v2369_v31, %s3149_s11 }
 0x2ed   : > { %2356 = vrot.lane.b32.xlu0 %v2354_v33, %s3147_s17  ;;  %2254 = vrot.lane.b32.xlu1 %v2249_v34, %s3143_s12 }
 0x2f1   : > { %2390 = vrot.lane.b32.xlu0 %v2385_v37, %s3148_s19  ;;  %2303 = vrot.lane.b32.xlu1 %v2299_v38, %s3144_s26 }
 0x2f5   : > { %2305 = vrot.lane.b32.xlu0 %v2300_v40, %s3144_s26  ;;  %2321 = vrot.lane.b32.xlu1 %v2319_v41, %s3145_s15 }
 0x2f9   : > { %2424 = vrot.lane.b32.xlu0 %v2420_v44, %s3150_s18  ;;  %2426 = vrot.lane.b32.xlu1 %v2421_v45, %s3150_s18 }
 0x2fd   : > { %2407 = vrot.lane.b32.xlu0 %v2405_v46, %s3151_s21  ;;  %2340 = vrot.lane.b32.xlu1 %v2335_v47, %s3143_s12  ;;  %s3157_s12 = smov 103  }
 0x301   : > { %2458 = vrot.lane.b32.xlu0 %v2456_v51, %s3149_s11  ;;  %2443 = vrot.lane.b32.xlu1 %v2441_v52, %s3152_s23  ;;  %s357_s11 = scalar_lea.vmem %s3692_s10, %s2786_s16 }
 0x305   : > { %2510 = vrot.lane.b32.xlu0 %v2506_v55, %s3150_s18  ;;  %2475 = vrot.lane.b32.xlu1 %v2471_v56, %s3148_s19 }
 0x309   : > { %2477 = vrot.lane.b32.xlu0 %v2472_v57, %s3148_s19  ;;  %2493 = vrot.lane.b32.xlu1 %v2491_v58, %s3151_s21 }
 0x30d   : > { %2528 = vrot.lane.b32.xlu0 %v2526_v61, %s3152_s23  ;;  %2560 = vrot.lane.b32.xlu1 %v2556_v62, %s3153_s20 }
 0x311   : > { %2562 = vrot.lane.b32.xlu0 %v2557_v1, %s3153_s20  ;;  %2512 = vrot.lane.b32.xlu1 %v2507_v2, %s3150_s18 }
 0x315   : > { %2596 = vrot.lane.b32.xlu0 %v2592_v4, %s3154_s25  ;;  %2543 = vrot.lane.b32.xlu1 %v2541_v5, %s3155_s22 }
 0x319   : > { %2579 = vrot.lane.b32.xlu0 %v2577_v7, %s3156_s24  ;;  %2598 = vrot.lane.b32.xlu1 %v2593_v8, %s3154_s25 }
 0x31d   : > { %2649 = vperm.xlu0 %3105, %v2646_v10   ;;  %2615 = vrot.lane.b32.xlu1 %v2613_v11, %s3157_s12 }
 0x34b   : > { %v2253_v15 = vpop.permute.xlu0 %2252  ;;  %v2217_v35 = vpop.permute.xlu1 %2216 }
 0x34f   : > { %v2236_v12 = vpop.permute.xlu0 %2235  ;;  %v2199_v16 = vpop.permute.xlu1 %2198 }
 0x350   : > { %2238 = vst.msk [vmem:[#allocation3 + $0x10] sm:$0xff] %vm2201_vm6, %v2236_v12  ;;  %2202 = vst.msk [vmem:[#allocation3] sm:$0xff] %vm2201_vm6, %v2199_v16 }
 0x353   : > { %v2219_v13 = vpop.permute.xlu0 %2218  ;;  %v2272_v17 = vpop.permute.xlu1 %2271 }
 0x354   : > { %v2221_v18 = vsel %vm2220_vm7, %v2217_v35, %v2219_v13  ;;  %2274 = vst.msk [vmem:[#allocation3 + $0x20] sm:$0xff] %vm2201_vm6, %v2272_v17 }
 0x355   : > { %2223 = vst.msk [vmem:[#allocation3 + $0x8] sm:$0xff] %vm2201_vm6, %v2221_v18 }
 0x357   : > { %v2287_v19 = vpop.permute.xlu0 %2286  ;;  %v2389_v20 = vpop.permute.xlu1 %2388  ;;  %v2621_v23 = vld [vmem:[#allocation3] sm:$0xff]  ;;  %v2623_v36 = vld [vmem:[#allocation3 + $0x10] sm:$0xff] }
 0x358   : > { %2289 = vst.msk [vmem:[#allocation3 + $0x28] sm:$0xff] %vm2201_vm6, %v2287_v19 }
 0x35b   : > { %v2339_v21 = vpop.permute.xlu0 %2338  ;;  %v2372_v22 = vpop.permute.xlu1 %2371  ;;  %v2625_v43 = vld [vmem:[#allocation3 + $0x20] sm:$0xff] }
 0x35c   : > { %2374 = vst.msk [vmem:[#allocation3 + $0x50] sm:$0xff] %vm2201_vm6, %v2372_v22  ;;  %v2622_v24 = vld [vmem:[#allocation3 + $0x8] sm:$0xff] }
 0x35d   : > { %v3027_v25 = vpack.c.bf16 %v2622_v24, %v2621_v23 }
 0x35f   : > { %v2357_v26 = vpop.permute.xlu0 %2356  ;;  %3028 = vmatpush1.bf16.msra.mxu1 %v3027_v25  ;;  %v2255_v27 = vpop.permute.xlu1 %2254  ;;  %v2626_v39 = vld [vmem:[#allocation3 + $0x28] sm:$0xff] }
 0x360   : > { %2359 = vst.msk [vmem:[#allocation3 + $0x48] sm:$0xff] %vm2201_vm6, %v2357_v26  ;;  %v2257_v28 = vsel %vm2256_vm8, %v2253_v15, %v2255_v27  ;;  %3029 = vmatprep.subr.bf16.mxu1 %v3127_v49  ;;  %v3033_v44 = vpack.c.bf16 %v2626_v39, %v2625_v43 }
 0x361   : > { %2259 = vst.msk [vmem:[#allocation3 + $0x18] sm:$0xff] %vm2201_vm6, %v2257_v28 }
 0x363   : > { %v2391_v29 = vpop.permute.xlu0 %2390  ;;  %v2304_v30 = vpop.permute.xlu1 %2303  ;;  %v2631_v63 = vld [vmem:[#allocation3 + $0x50] sm:$0xff] }
 0x364   : > { %v2393_v31 = vsel %vm2392_vm9, %v2389_v20, %v2391_v29 }
 0x365   : > { %2395 = vst.msk [vmem:[#allocation3 + $0x58] sm:$0xff] %vm2201_vm6, %v2393_v31  ;;  %v2619_v31 = vld [vmem:[%s3689_s7] sm:$0xff] }
 0x367   : > { %v2306_v32 = vpop.permute.xlu0 %2305  ;;  %v2322_v33 = vpop.permute.xlu1 %2321  ;;  %v2630_v57 = vld [vmem:[#allocation3 + $0x48] sm:$0xff] }
 0x368   : > { %v2307_v34 = vsel %vm2220_vm7, %v2304_v30, %v2306_v32  ;;  %2324 = vst.msk [vmem:[#allocation3 + $0x38] sm:$0xff] %vm2201_vm6, %v2322_v33  ;;  %v2624_v37 = vld [vmem:[#allocation3 + $0x18] sm:$0xff] }
 0x369   : > { %2309 = vst.msk [vmem:[#allocation3 + $0x30] sm:$0xff] %vm2201_vm6, %v2307_v34  ;;  %v3030_v38 = vpack.c.bf16 %v2624_v37, %v2623_v36 }
 0x36b   : > { %v2425_v40 = vpop.permute.xlu0 %2424  ;;  %3031 = vmatpush1.bf16.msra.mxu1 %v3030_v38  ;;  %v2427_v41 = vpop.permute.xlu1 %2426 }
 0x36c   : > { %v2429_v42 = vsel %vm2428_vm10, %v2425_v40, %v2427_v41  ;;  %3032 = vmatprep.subr.bf16.mxu1 %v3127_v49  ;;  %v2632_v59 = vld [vmem:[#allocation3 + $0x58] sm:$0xff] }
 0x36d   : > { %2431 = vst.msk [vmem:[#allocation3 + $0x68] sm:$0xff] %vm2201_vm6, %v2429_v42  ;;  %v3042_v1 = vpack.c.bf16 %v2632_v59, %v2631_v63 }
 0x36f   : > { %v2408_v45 = vpop.permute.xlu0 %2407  ;;  %3034 = vmatpush1.bf16.msra.mxu1 %v3033_v44  ;;  %v2341_v46 = vpop.permute.xlu1 %2340  ;;  %v2628_v47 = vld [vmem:[#allocation3 + $0x38] sm:$0xff] }
 0x370   : > { %2410 = vst.msk [vmem:[#allocation3 + $0x60] sm:$0xff] %vm2201_vm6, %v2408_v45  ;;  %v2342_v48 = vsel %vm2256_vm8, %v2339_v21, %v2341_v46  ;;  %3035 = vmatprep.subr.bf16.mxu1 %v3127_v49  ;;  %v2627_v50 = vld [vmem:[#allocation3 + $0x30] sm:$0xff] }
 0x371   : > { %2344 = vst.msk [vmem:[#allocation3 + $0x40] sm:$0xff] %vm2201_vm6, %v2342_v48  ;;  %v3036_v51 = vpack.c.bf16 %v2628_v47, %v2627_v50 }
 0x373   : > { %v2459_v52 = vpop.permute.xlu0 %2458  ;;  %3037 = vmatpush1.bf16.msra.mxu1 %v3036_v51  ;;  %v2444_v53 = vpop.permute.xlu1 %2443 }
 0x374   : > { %2461 = vst.msk [vmem:[#allocation3 + $0x78] sm:$0xff] %vm2201_vm6, %v2459_v52  ;;  %2446 = vst.msk [vmem:[#allocation3 + $0x70] sm:$0xff] %vm2201_vm6, %v2444_v53  ;;  %3038 = vmatprep.subr.bf16.mxu1 %v3127_v49  ;;  %v2634_v5 = vld [vmem:[#allocation3 + $0x68] sm:$0xff] }
 0x377   : > { %v2511_v54 = vpop.permute.xlu0 %2510  ;;  %v2476_v55 = vpop.permute.xlu1 %2475  ;;  %v2633_v2 = vld [vmem:[#allocation3 + $0x60] sm:$0xff] }
 0x378   : > { %v2629_v56 = vld [vmem:[#allocation3 + $0x40] sm:$0xff]  ;;  %v3045_v6 = vpack.c.bf16 %v2634_v5, %v2633_v2 }
 0x379   : > { %v3039_v58 = vpack.c.bf16 %v2630_v57, %v2629_v56 }
 0x37b   : > { %v2478_v60 = vpop.permute.xlu0 %2477  ;;  %3040 = vmatpush1.bf16.msra.mxu1 %v3039_v58  ;;  %v2494_v61 = vpop.permute.xlu1 %2493  ;;  %v2635_v7 = vld [vmem:[#allocation3 + $0x70] sm:$0xff]  ;;  %v2636_v8 = vld [vmem:[#allocation3 + $0x78] sm:$0xff] }
 0x37c   : > { %v2479_v62 = vsel %vm2392_vm9, %v2476_v55, %v2478_v60  ;;  %2496 = vst.msk [vmem:[#allocation3 + $0x88] sm:$0xff] %vm2201_vm6, %v2494_v61  ;;  %3041 = vmatprep.subr.bf16.mxu1 %v3127_v49  ;;  %v3048_v15 = vpack.c.bf16 %v2636_v8, %v2635_v7 }
 0x37d   : > { %2481 = vst.msk [vmem:[#allocation3 + $0x80] sm:$0xff] %vm2201_vm6, %v2479_v62 }
 0x37f   : > { %v2529_v3 = vpop.permute.xlu0 %2528  ;;  %3043 = vmatpush1.bf16.msra.mxu1 %v3042_v1  ;;  %v2561_v4 = vpop.permute.xlu1 %2560 }
 0x380   : > { %2531 = vst.msk [vmem:[#allocation3 + $0x98] sm:$0xff] %vm2201_vm6, %v2529_v3  ;;  %3044 = vmatprep.subr.bf16.mxu1 %v3127_v49 }
 0x383   : > { %v2563_v9 = vpop.permute.xlu0 %2562  ;;  %3046 = vmatpush1.bf16.msra.mxu1 %v3045_v6  ;;  %v2513_v10 = vpop.permute.xlu1 %2512  ;;  %v2638_v12 = vld [vmem:[#allocation3 + $0x88] sm:$0xff] }
 0x384   : > { %v2565_v11 = vsel %vm2564_vm11, %v2561_v4, %v2563_v9  ;;  %v2514_v14 = vsel %vm2428_vm10, %v2511_v54, %v2513_v10  ;;  %3047 = vmatprep.subr.bf16.mxu1 %v3127_v49  ;;  %v2637_v35 = vld [vmem:[#allocation3 + $0x80] sm:$0xff] }
 0x385   : > { %2567 = vst.msk [vmem:[#allocation3 + $0xa8] sm:$0xff] %vm2201_vm6, %v2565_v11  ;;  %2516 = vst.msk [vmem:[#allocation3 + $0x90] sm:$0xff] %vm2201_vm6, %v2514_v14  ;;  %v3051_v17 = vpack.c.bf16 %v2638_v12, %v2637_v35 }
 0x387   : > { %v2597_v16 = vpop.permute.xlu0 %2596  ;;  %3049 = vmatpush1.bf16.msra.mxu1 %v3048_v15  ;;  %v2544_v13 = vpop.permute.xlu1 %2543  ;;  %v2640_v22 = vld [vmem:[#allocation3 + $0x98] sm:$0xff] }
 0x388   : > { %2546 = vst.msk [vmem:[#allocation3 + $0xa0] sm:$0xff] %vm2201_vm6, %v2544_v13  ;;  %3050 = vmatprep.subr.bf16.mxu1 %v3127_v49 }
 0x38b   : > { %v2580_v18 = vpop.permute.xlu0 %2579  ;;  %3052 = vmatpush1.bf16.msra.mxu1 %v3051_v17  ;;  %v2599_v19 = vpop.permute.xlu1 %2598 }
 0x38c   : > { %2582 = vst.msk [vmem:[#allocation3 + $0xb0] sm:$0xff] %vm2201_vm6, %v2580_v18  ;;  %v2601_v20 = vsel %vm2600_vm12, %v2597_v16, %v2599_v19  ;;  %3053 = vmatprep.subr.bf16.mxu1 %v3127_v49  ;;  %v2639_v21 = vld [vmem:[#allocation3 + $0x90] sm:$0xff]  ;;  %v2642_v26 = vld [vmem:[#allocation3 + $0xa8] sm:$0xff] }
 0x38d   : > { %2603 = vst.msk [vmem:[#allocation3 + $0xb8] sm:$0xff] %vm2201_vm6, %v2601_v20  ;;  %v3054_v23 = vpack.c.bf16 %v2640_v22, %v2639_v21 }
 0x38f   : > { %3055 = vmatpush1.bf16.msra.mxu1 %v3054_v23  ;;  %v2616_v24 = vpop.permute.xlu1 %2615  ;;  %v2641_v25 = vld [vmem:[#allocation3 + $0xa0] sm:$0xff] }
 0x390   : > { %2618 = vst.msk [vmem:[#allocation3 + $0xc0] sm:$0xff] %vm2201_vm6, %v2616_v24  ;;  %3056 = vmatprep.subr.bf16.mxu1 %v3127_v49  ;;  %v3057_v27 = vpack.c.bf16 %v2642_v26, %v2641_v25 }
 0x393   : > { %3058 = vmatpush1.bf16.msra.mxu1 %v3057_v27  ;;  %v2643_v28 = vld [vmem:[#allocation3 + $0xb0] sm:$0xff] }
 0x394   : > { %3059 = vmatprep.subr.bf16.mxu1 %v3127_v49  ;;  %v2644_v29 = vld [vmem:[#allocation3 + $0xb8] sm:$0xff] }
 0x395   : > { %v3060_v30 = vpack.c.bf16 %v2644_v29, %v2643_v28 }
 0x397   : > { %3061 = vmatpush1.bf16.msra.mxu1 %v3060_v30  ;;  %v2645_v32 = vld [vmem:[#allocation3 + $0xc0] sm:$0xff] }
 0x398   : > { %2703 = vmatprep.subr.mxu1 %v3124_v0 }
 0x39b   : > { %2704 = vmatpush1.msra.mxu1 %v2645_v32 }
 0x39c   : > { %2720 = vmatmul.mubr.f32.vlgmr.msra.gmra.mrb[16].mxu1 %v2619_v31  ;;  %v2650_v33 = vpop.permute.xlu0 %2649 }
 0x46f   : > { %v2721_v34 = vpop.f32.mrb[16].mxu1 }
 0x470   : > { %v2722_v36 = vadd.f32 %v2721_v34, %v2650_v33  ;;  %v2723_v37 = vpop.f32.mrb[17].mxu1 }
 0x472   : > { %v2725_v49 = vmax.f32 %v2722_v36, 0.0 }
 0x474   : > { %2726 = vst [vmem:[%s357_s11] sm:$0xff] %v2725_v49 }
 0x475 PF: > { %s20_s13 = sadd.s32 1, %s3122_s13  }
 0x476   : > { %p17_p4 = scmp.ge.s32.totalorder %s20_s13, 4  }
 0x478   :  { %19 = sbr.rel (!%p17_p4) target bundleno = 1 (0x1), region = 98 }

</bundles_post_ra>
